<compile_context>
chip_gen: v7x
topology: tpu7x:2x2x1
jax: 0.10.0
libtpu: 0.0.40
codegen_flags: <defaults>
</compile_context>

<pallas_src>
import functools

import jax
import jax.numpy as jnp
from jax.experimental import pallas as pl
from jax.experimental.pallas import tpu as pltpu


# ----------------------------------------------------------------------------
# The single fused kernel
# ----------------------------------------------------------------------------
def _textrnn_kernel(*refs, seq_len, batch, hidden, num_layers):
    T, B, H = seq_len, batch, hidden
    f32 = jnp.float32

    it = iter(refs)
    tokens_ref = next(it)                      # SMEM (B, T) int32
    emb_ref = next(it)                         # VMEM (vocab, 1, D)
    inner_refs = [(next(it), next(it), next(it), next(it))
                  for _ in range(num_layers - 1)]
    w_ih_l_ref, b_i_l_ref, w_hh_l_ref, b_hh_l_ref = (
        next(it), next(it), next(it), next(it))
    fc_w_ref, fc_b_ref = next(it), next(it)
    logits_ref = next(it)

    # ---- Embedding gather (token ids in SMEM, table VMEM-resident) ---------
    # Time-major flattened activation: row t*B + b = emb[tokens[b, t]].
    rows = []
    for t in range(T):
        for b in range(B):
            rows.append(emb_ref[tokens_ref[b, t]])          # (1, D)
    x = jnp.concatenate(rows, axis=0).astype(f32)           # (T*B, D)

    # ---- Inner bidirectional layers (fwd & bwd interleaved) ----------------
    # Column order everywhere: [r_f r_b | z_f z_b | n_f n_b]  (gate-major).
    for (w_ih_ref, b_i_ref, w_hh_ref, b_hh_ref) in inner_refs:
        w_hh = w_hh_ref[...]                                 # (2H, 6H) block-diag
        b_hh = b_hh_ref[...]                                 # (1, 6H)  (only n cols)
        # Hoisted input projection: one fused dot for all steps & both dirs.
        gi = jnp.dot(x, w_ih_ref[...], preferred_element_type=f32) + b_i_ref[...]

        # Pre-arrange per-step gate inputs (off the serial chain):
        # fwd reads time i, bwd reads time T-1-i.
        gi_steps = []
        for i in range(T):
            rf = slice(i * B, (i + 1) * B)
            rb = slice((T - 1 - i) * B, (T - i) * B)
            gi_steps.append(jnp.concatenate(
                [gi[rf, 0:H],         gi[rb, H:2 * H],
                 gi[rf, 2 * H:3 * H], gi[rb, 3 * H:4 * H],
                 gi[rf, 4 * H:5 * H], gi[rb, 5 * H:6 * H]], axis=1))

        h = jnp.zeros((B, 2 * H), f32)                       # [h_fwd | h_bwd]
        outs_f = [None] * T
        outs_b = [None] * T
        for i in range(T):                                   # static unroll (T small)
            # ONE block-diagonal MXU push per step for both directions.
            gh = jnp.dot(h, w_hh, preferred_element_type=f32) + b_hh   # (B, 6H)
            g = gi_steps[i]
            rz = jax.nn.sigmoid(g[:, 0:4 * H] + gh[:, 0:4 * H])        # (B, 4H)
            r = rz[:, 0:2 * H]
            z = rz[:, 2 * H:4 * H]
            n = jnp.tanh(g[:, 4 * H:6 * H] + r * gh[:, 4 * H:6 * H])   # (B, 2H)
            h = (1.0 - z) * n + z * h
            outs_f[i] = h[:, 0:H]
            outs_b[T - 1 - i] = h[:, H:2 * H]

        # Next layer input, assembled once after the loop (no per-step stores).
        x = jnp.concatenate(
            [jnp.concatenate(outs_f, axis=0),
             jnp.concatenate(outs_b, axis=0)], axis=1)       # (T*B, 2H)

    # ---- Last layer: backward direction only + fused classifier ------------
    # fc(h_n[-1]) only needs the final backward hidden state of the last layer
    # (fc weight is (H, C) in the module), so its forward direction is skipped.
    w_hh = w_hh_l_ref[...]                                   # (H, 3H) [r z n]
    b_hh = b_hh_l_ref[...]                                   # (1, 3H) (only n col)
    gi = jnp.dot(x, w_ih_l_ref[...], preferred_element_type=f32) + b_i_l_ref[...]
    h = jnp.zeros((B, H), f32)
    for t in range(T - 1, -1, -1):
        gh = jnp.dot(h, w_hh, preferred_element_type=f32) + b_hh      # (B, 3H)
        g = gi[t * B:(t + 1) * B]
        rz = jax.nn.sigmoid(g[:, 0:2 * H] + gh[:, 0:2 * H])
        n = jnp.tanh(g[:, 2 * H:3 * H] + rz[:, 0:H] * gh[:, 2 * H:3 * H])
        h = (1.0 - rz[:, H:2 * H]) * n + rz[:, H:2 * H] * h

    logits_ref[...] = (jnp.dot(h, fc_w_ref[...], preferred_element_type=f32)
                       + fc_b_ref[...])


# ----------------------------------------------------------------------------
# Wrapper: one pallas_call for the whole forward pass
# ----------------------------------------------------------------------------
def textrnn_forward(tokens, params):
    B, T = tokens.shape
    H = params["fc_w"].shape[0]
    C = params["fc_w"].shape[1]
    num_layers = len(params["inner"]) + 1

    args = [tokens.astype(jnp.int32), params["embedding"]]
    for lw in params["inner"]:
        args += [lw["w_ih"], lw["b_i"], lw["w_hh"], lw["b_hh"]]
    lw = params["last"]
    args += [lw["w_ih"], lw["b_i"], lw["w_hh"], lw["b_hh"]]
    args += [params["fc_w"], params["fc_b"]]

    smem_spec = pl.BlockSpec(memory_space=pltpu.MemorySpace.SMEM)
    vmem_spec = pl.BlockSpec(memory_space=pltpu.MemorySpace.VMEM)
    kernel = functools.partial(_textrnn_kernel, seq_len=T, batch=B,
                               hidden=H, num_layers=num_layers)
    return pl.pallas_call(
        kernel,
        out_shape=jax.ShapeDtypeStruct((B, C), jnp.float32),
        in_specs=[smem_spec] + [vmem_spec] * (len(args) - 1),
        out_specs=vmem_spec,
    )(*args)


# ----------------------------------------------------------------------------
# Deterministic parameter construction, stored directly in the fused layout.
# ----------------------------------------------------------------------------
def init_params(key, *, vocab_size, emb_dim, hidden_size, num_layers, class_num):
    H = hidden_size
    scale = 1.0 / float(H) ** 0.5
    keys = iter(jax.random.split(key, 3 + 8 * num_layers))

    def u(shape):
        return jax.random.uniform(next(keys), shape, jnp.float32, -scale, scale)

    emb = jax.random.normal(next(keys), (vocab_size, emb_dim), jnp.float32)
    params = {"embedding": emb.reshape(vocab_size, 1, emb_dim)}

    # Raw per-gate weights (gate order [r, z, n]; already transposed vs. PyTorch).
    raw = []
    for layer in range(num_layers):
        d_in = emb_dim if layer == 0 else 2 * H
        dirs = []
        for _ in range(2):                     # [0]=forward, [1]=backward
            dirs.append((u((3, d_in, H)),      # w_ih
                         u((3, H, H)),         # w_hh
                         u((3, H)),            # b_ih
                         u((3, H))))           # b_hh
        raw.append(dirs)

    zhh = jnp.zeros((H, H), jnp.float32)
    zb = jnp.zeros((H,), jnp.float32)

    # Inner bidirectional layers: column order [r_f r_b z_f z_b n_f n_b].
    inner = []
    for layer in range(num_layers - 1):
        (wif, whf, bif, bhf), (wib, whb, bib, bhb) = raw[layer]
        w_ih = jnp.concatenate(
            [wif[0], wib[0], wif[1], wib[1], wif[2], wib[2]], axis=1)
        b_i = jnp.concatenate(
            [bif[0] + bhf[0], bib[0] + bhb[0],
             bif[1] + bhf[1], bib[1] + bhb[1],
             bif[2], bib[2]])[None, :]
        w_hh = jnp.concatenate(
            [jnp.concatenate([whf[0], zhh, whf[1], zhh, whf[2], zhh], axis=1),
             jnp.concatenate([zhh, whb[0], zhh, whb[1], zhh, whb[2]], axis=1)],
            axis=0)                                          # (2H, 6H) block-diag
        b_hh = jnp.concatenate([zb, zb, zb, zb, bhf[2], bhb[2]])[None, :]
        inner.append({"w_ih": w_ih, "b_i": b_i, "w_hh": w_hh, "b_hh": b_hh})
    params["inner"] = inner

    # Last layer: backward direction only (forward direction is dead code for
    # fc(h_n[-1])); column order [r z n].
    wib, whb, bib, bhb = raw[num_layers - 1][1]
    params["last"] = {
        "w_ih": jnp.concatenate([wib[0], wib[1], wib[2]], axis=1),
        "b_i": jnp.concatenate([bib[0] + bhb[0], bib[1] + bhb[1], bib[2]])[None, :],
        "w_hh": jnp.concatenate([whb[0], whb[1], whb[2]], axis=1),
        "b_hh": jnp.concatenate([zb, zb, bhb[2]])[None, :],
    }

    params["fc_w"] = u((H, class_num))
    params["fc_b"] = u((1, class_num))
    return params


if __name__ == "__main__":
    VOCAB = 50
    EMB_DIM = 16
    HIDDEN = 32
    NUM_LAYERS = 2
    CLASS_NUM = 4
    BATCH = 2
    SEQ = 8

    key = jax.random.PRNGKey(0)
    pkey, xkey = jax.random.split(key)
    params = init_params(pkey, vocab_size=VOCAB, emb_dim=EMB_DIM,
                         hidden_size=HIDDEN, num_layers=NUM_LAYERS,
                         class_num=CLASS_NUM)

    # x: (B, T) int token ids, matching the nn.Embedding input convention.
    tokens = jax.random.randint(xkey, (BATCH, SEQ), 0, VOCAB, dtype=jnp.int32)

    fwd = jax.jit(textrnn_forward)
    logits = fwd(tokens, params)
    jax.block_until_ready(logits)

    assert logits.shape == (BATCH, CLASS_NUM)
    assert logits.dtype == jnp.float32
    print("KERNEL_OK")
</pallas_src>

<mosaic_0001>
module attributes {stable_mosaic.version = 11 : i64} {
  func.func @_textrnn_kernel(%arg0: memref<2x8xi32, #tpu.memory_space<smem>>, %arg1: memref<50x1x16xf32, #tpu.memory_space<vmem>>, %arg2: memref<16x192xf32, #tpu.memory_space<vmem>>, %arg3: memref<1x192xf32, #tpu.memory_space<vmem>>, %arg4: memref<64x192xf32, #tpu.memory_space<vmem>>, %arg5: memref<1x192xf32, #tpu.memory_space<vmem>>, %arg6: memref<64x96xf32, #tpu.memory_space<vmem>>, %arg7: memref<1x96xf32, #tpu.memory_space<vmem>>, %arg8: memref<32x96xf32, #tpu.memory_space<vmem>>, %arg9: memref<1x96xf32, #tpu.memory_space<vmem>>, %arg10: memref<32x4xf32, #tpu.memory_space<vmem>>, %arg11: memref<1x4xf32, #tpu.memory_space<vmem>>, %arg12: memref<2x4xf32, #tpu.memory_space<vmem>>) attributes {dimension_semantics = [], scalar_prefetch = 0 : i64, scratch_operands = 0 : i64, tpu.core_type = #tpu.core_type<tc>} {
    %c0 = arith.constant 0 : index
    %c0_0 = arith.constant 0 : index
    %0 = memref.load %arg0[%c0, %c0_0] : memref<2x8xi32, #tpu.memory_space<smem>>
    %1 = arith.index_cast %0 : i32 to index
    %c0_1 = arith.constant 0 : index
    %c0_2 = arith.constant 0 : index
    %2 = vector.load %arg1[%1, %c0_1, %c0_2] : memref<50x1x16xf32, #tpu.memory_space<vmem>>, vector<1x1x16xf32>
    %3 = vector.shape_cast %2 : vector<1x1x16xf32> to vector<1x16xf32>
    %c1 = arith.constant 1 : index
    %c0_3 = arith.constant 0 : index
    %4 = memref.load %arg0[%c1, %c0_3] : memref<2x8xi32, #tpu.memory_space<smem>>
    %5 = arith.index_cast %4 : i32 to index
    %c0_4 = arith.constant 0 : index
    %c0_5 = arith.constant 0 : index
    %6 = vector.load %arg1[%5, %c0_4, %c0_5] : memref<50x1x16xf32, #tpu.memory_space<vmem>>, vector<1x1x16xf32>
    %7 = vector.shape_cast %6 : vector<1x1x16xf32> to vector<1x16xf32>
    %c0_6 = arith.constant 0 : index
    %c1_7 = arith.constant 1 : index
    %8 = memref.load %arg0[%c0_6, %c1_7] : memref<2x8xi32, #tpu.memory_space<smem>>
    %9 = arith.index_cast %8 : i32 to index
    %c0_8 = arith.constant 0 : index
    %c0_9 = arith.constant 0 : index
    %10 = vector.load %arg1[%9, %c0_8, %c0_9] : memref<50x1x16xf32, #tpu.memory_space<vmem>>, vector<1x1x16xf32>
    %11 = vector.shape_cast %10 : vector<1x1x16xf32> to vector<1x16xf32>
    %c1_10 = arith.constant 1 : index
    %c1_11 = arith.constant 1 : index
    %12 = memref.load %arg0[%c1_10, %c1_11] : memref<2x8xi32, #tpu.memory_space<smem>>
    %13 = arith.index_cast %12 : i32 to index
    %c0_12 = arith.constant 0 : index
    %c0_13 = arith.constant 0 : index
    %14 = vector.load %arg1[%13, %c0_12, %c0_13] : memref<50x1x16xf32, #tpu.memory_space<vmem>>, vector<1x1x16xf32>
    %15 = vector.shape_cast %14 : vector<1x1x16xf32> to vector<1x16xf32>
    %c0_14 = arith.constant 0 : index
    %c2 = arith.constant 2 : index
    %16 = memref.load %arg0[%c0_14, %c2] : memref<2x8xi32, #tpu.memory_space<smem>>
    %17 = arith.index_cast %16 : i32 to index
    %c0_15 = arith.constant 0 : index
    %c0_16 = arith.constant 0 : index
    %18 = vector.load %arg1[%17, %c0_15, %c0_16] : memref<50x1x16xf32, #tpu.memory_space<vmem>>, vector<1x1x16xf32>
    %19 = vector.shape_cast %18 : vector<1x1x16xf32> to vector<1x16xf32>
    %c1_17 = arith.constant 1 : index
    %c2_18 = arith.constant 2 : index
    %20 = memref.load %arg0[%c1_17, %c2_18] : memref<2x8xi32, #tpu.memory_space<smem>>
    %21 = arith.index_cast %20 : i32 to index
    %c0_19 = arith.constant 0 : index
    %c0_20 = arith.constant 0 : index
    %22 = vector.load %arg1[%21, %c0_19, %c0_20] : memref<50x1x16xf32, #tpu.memory_space<vmem>>, vector<1x1x16xf32>
    %23 = vector.shape_cast %22 : vector<1x1x16xf32> to vector<1x16xf32>
    %c0_21 = arith.constant 0 : index
    %c3 = arith.constant 3 : index
    %24 = memref.load %arg0[%c0_21, %c3] : memref<2x8xi32, #tpu.memory_space<smem>>
    %25 = arith.index_cast %24 : i32 to index
    %c0_22 = arith.constant 0 : index
    %c0_23 = arith.constant 0 : index
    %26 = vector.load %arg1[%25, %c0_22, %c0_23] : memref<50x1x16xf32, #tpu.memory_space<vmem>>, vector<1x1x16xf32>
    %27 = vector.shape_cast %26 : vector<1x1x16xf32> to vector<1x16xf32>
    %c1_24 = arith.constant 1 : index
    %c3_25 = arith.constant 3 : index
    %28 = memref.load %arg0[%c1_24, %c3_25] : memref<2x8xi32, #tpu.memory_space<smem>>
    %29 = arith.index_cast %28 : i32 to index
    %c0_26 = arith.constant 0 : index
    %c0_27 = arith.constant 0 : index
    %30 = vector.load %arg1[%29, %c0_26, %c0_27] : memref<50x1x16xf32, #tpu.memory_space<vmem>>, vector<1x1x16xf32>
    %31 = vector.shape_cast %30 : vector<1x1x16xf32> to vector<1x16xf32>
    %c0_28 = arith.constant 0 : index
    %c4 = arith.constant 4 : index
    %32 = memref.load %arg0[%c0_28, %c4] : memref<2x8xi32, #tpu.memory_space<smem>>
    %33 = arith.index_cast %32 : i32 to index
    %c0_29 = arith.constant 0 : index
    %c0_30 = arith.constant 0 : index
    %34 = vector.load %arg1[%33, %c0_29, %c0_30] : memref<50x1x16xf32, #tpu.memory_space<vmem>>, vector<1x1x16xf32>
    %35 = vector.shape_cast %34 : vector<1x1x16xf32> to vector<1x16xf32>
    %c1_31 = arith.constant 1 : index
    %c4_32 = arith.constant 4 : index
    %36 = memref.load %arg0[%c1_31, %c4_32] : memref<2x8xi32, #tpu.memory_space<smem>>
    %37 = arith.index_cast %36 : i32 to index
    %c0_33 = arith.constant 0 : index
    %c0_34 = arith.constant 0 : index
    %38 = vector.load %arg1[%37, %c0_33, %c0_34] : memref<50x1x16xf32, #tpu.memory_space<vmem>>, vector<1x1x16xf32>
    %39 = vector.shape_cast %38 : vector<1x1x16xf32> to vector<1x16xf32>
    %c0_35 = arith.constant 0 : index
    %c5 = arith.constant 5 : index
    %40 = memref.load %arg0[%c0_35, %c5] : memref<2x8xi32, #tpu.memory_space<smem>>
    %41 = arith.index_cast %40 : i32 to index
    %c0_36 = arith.constant 0 : index
    %c0_37 = arith.constant 0 : index
    %42 = vector.load %arg1[%41, %c0_36, %c0_37] : memref<50x1x16xf32, #tpu.memory_space<vmem>>, vector<1x1x16xf32>
    %43 = vector.shape_cast %42 : vector<1x1x16xf32> to vector<1x16xf32>
    %c1_38 = arith.constant 1 : index
    %c5_39 = arith.constant 5 : index
    %44 = memref.load %arg0[%c1_38, %c5_39] : memref<2x8xi32, #tpu.memory_space<smem>>
    %45 = arith.index_cast %44 : i32 to index
    %c0_40 = arith.constant 0 : index
    %c0_41 = arith.constant 0 : index
    %46 = vector.load %arg1[%45, %c0_40, %c0_41] : memref<50x1x16xf32, #tpu.memory_space<vmem>>, vector<1x1x16xf32>
    %47 = vector.shape_cast %46 : vector<1x1x16xf32> to vector<1x16xf32>
    %c0_42 = arith.constant 0 : index
    %c6 = arith.constant 6 : index
    %48 = memref.load %arg0[%c0_42, %c6] : memref<2x8xi32, #tpu.memory_space<smem>>
    %49 = arith.index_cast %48 : i32 to index
    %c0_43 = arith.constant 0 : index
    %c0_44 = arith.constant 0 : index
    %50 = vector.load %arg1[%49, %c0_43, %c0_44] : memref<50x1x16xf32, #tpu.memory_space<vmem>>, vector<1x1x16xf32>
    %51 = vector.shape_cast %50 : vector<1x1x16xf32> to vector<1x16xf32>
    %c1_45 = arith.constant 1 : index
    %c6_46 = arith.constant 6 : index
    %52 = memref.load %arg0[%c1_45, %c6_46] : memref<2x8xi32, #tpu.memory_space<smem>>
    %53 = arith.index_cast %52 : i32 to index
    %c0_47 = arith.constant 0 : index
    %c0_48 = arith.constant 0 : index
    %54 = vector.load %arg1[%53, %c0_47, %c0_48] : memref<50x1x16xf32, #tpu.memory_space<vmem>>, vector<1x1x16xf32>
    %55 = vector.shape_cast %54 : vector<1x1x16xf32> to vector<1x16xf32>
    %c0_49 = arith.constant 0 : index
    %c7 = arith.constant 7 : index
    %56 = memref.load %arg0[%c0_49, %c7] : memref<2x8xi32, #tpu.memory_space<smem>>
    %57 = arith.index_cast %56 : i32 to index
    %c0_50 = arith.constant 0 : index
    %c0_51 = arith.constant 0 : index
    %58 = vector.load %arg1[%57, %c0_50, %c0_51] : memref<50x1x16xf32, #tpu.memory_space<vmem>>, vector<1x1x16xf32>
    %59 = vector.shape_cast %58 : vector<1x1x16xf32> to vector<1x16xf32>
    %c1_52 = arith.constant 1 : index
    %c7_53 = arith.constant 7 : index
    %60 = memref.load %arg0[%c1_52, %c7_53] : memref<2x8xi32, #tpu.memory_space<smem>>
    %61 = arith.index_cast %60 : i32 to index
    %c0_54 = arith.constant 0 : index
    %c0_55 = arith.constant 0 : index
    %62 = vector.load %arg1[%61, %c0_54, %c0_55] : memref<50x1x16xf32, #tpu.memory_space<vmem>>, vector<1x1x16xf32>
    %63 = vector.shape_cast %62 : vector<1x1x16xf32> to vector<1x16xf32>
    %64 = tpu.concatenate %3, %7, %11, %15, %19, %23, %27, %31, %35, %39, %43, %47, %51, %55, %59, %63 in 0 : vector<1x16xf32>, vector<1x16xf32>, vector<1x16xf32>, vector<1x16xf32>, vector<1x16xf32>, vector<1x16xf32>, vector<1x16xf32>, vector<1x16xf32>, vector<1x16xf32>, vector<1x16xf32>, vector<1x16xf32>, vector<1x16xf32>, vector<1x16xf32>, vector<1x16xf32>, vector<1x16xf32>, vector<1x16xf32> -> vector<16x16xf32>
    %c0_56 = arith.constant 0 : index
    %c0_57 = arith.constant 0 : index
    %65 = vector.load %arg4[%c0_56, %c0_57] : memref<64x192xf32, #tpu.memory_space<vmem>>, vector<64x192xf32>
    %c0_58 = arith.constant 0 : index
    %c0_59 = arith.constant 0 : index
    %66 = vector.load %arg5[%c0_58, %c0_59] : memref<1x192xf32, #tpu.memory_space<vmem>>, vector<1x192xf32>
    %c0_60 = arith.constant 0 : index
    %c0_61 = arith.constant 0 : index
    %67 = vector.load %arg2[%c0_60, %c0_61] : memref<16x192xf32, #tpu.memory_space<vmem>>, vector<16x192xf32>
    %cst = arith.constant dense<0.000000e+00> : vector<16x192xf32>
    %68 = tpu.matmul %64, %67, %cst {dimension_numbers = #tpu.dot_dimension_numbers<[1], [0], [0], [1], [0, 0, 1, 1], [], []>} : vector<16x16xf32>, vector<16x192xf32>, vector<16x192xf32> -> vector<16x192xf32>
    %c0_62 = arith.constant 0 : index
    %c0_63 = arith.constant 0 : index
    %69 = vector.load %arg3[%c0_62, %c0_63] : memref<1x192xf32, #tpu.memory_space<vmem>>, vector<1x192xf32>
    %70 = vector.broadcast %69 : vector<1x192xf32> to vector<16x192xf32>
    %71 = arith.addf %68, %70 : vector<16x192xf32>
    %72 = vector.extract_strided_slice %71 {offsets = [0, 0], sizes = [2, 32], strides = [1, 1]} : vector<16x192xf32> to vector<2x32xf32>
    %73 = vector.extract_strided_slice %71 {offsets = [14, 32], sizes = [2, 32], strides = [1, 1]} : vector<16x192xf32> to vector<2x32xf32>
    %74 = vector.extract_strided_slice %71 {offsets = [0, 64], sizes = [2, 32], strides = [1, 1]} : vector<16x192xf32> to vector<2x32xf32>
    %75 = vector.extract_strided_slice %71 {offsets = [14, 96], sizes = [2, 32], strides = [1, 1]} : vector<16x192xf32> to vector<2x32xf32>
    %76 = vector.extract_strided_slice %71 {offsets = [0, 128], sizes = [2, 32], strides = [1, 1]} : vector<16x192xf32> to vector<2x32xf32>
    %77 = vector.extract_strided_slice %71 {offsets = [14, 160], sizes = [2, 32], strides = [1, 1]} : vector<16x192xf32> to vector<2x32xf32>
    %78 = tpu.concatenate %72, %73, %74, %75, %76, %77 in 1 : vector<2x32xf32>, vector<2x32xf32>, vector<2x32xf32>, vector<2x32xf32>, vector<2x32xf32>, vector<2x32xf32> -> vector<2x192xf32>
    %79 = vector.extract_strided_slice %71 {offsets = [2, 0], sizes = [2, 32], strides = [1, 1]} : vector<16x192xf32> to vector<2x32xf32>
    %80 = vector.extract_strided_slice %71 {offsets = [12, 32], sizes = [2, 32], strides = [1, 1]} : vector<16x192xf32> to vector<2x32xf32>
    %81 = vector.extract_strided_slice %71 {offsets = [2, 64], sizes = [2, 32], strides = [1, 1]} : vector<16x192xf32> to vector<2x32xf32>
    %82 = vector.extract_strided_slice %71 {offsets = [12, 96], sizes = [2, 32], strides = [1, 1]} : vector<16x192xf32> to vector<2x32xf32>
    %83 = vector.extract_strided_slice %71 {offsets = [2, 128], sizes = [2, 32], strides = [1, 1]} : vector<16x192xf32> to vector<2x32xf32>
    %84 = vector.extract_strided_slice %71 {offsets = [12, 160], sizes = [2, 32], strides = [1, 1]} : vector<16x192xf32> to vector<2x32xf32>
    %85 = tpu.concatenate %79, %80, %81, %82, %83, %84 in 1 : vector<2x32xf32>, vector<2x32xf32>, vector<2x32xf32>, vector<2x32xf32>, vector<2x32xf32>, vector<2x32xf32> -> vector<2x192xf32>
    %86 = vector.extract_strided_slice %71 {offsets = [4, 0], sizes = [2, 32], strides = [1, 1]} : vector<16x192xf32> to vector<2x32xf32>
    %87 = vector.extract_strided_slice %71 {offsets = [10, 32], sizes = [2, 32], strides = [1, 1]} : vector<16x192xf32> to vector<2x32xf32>
    %88 = vector.extract_strided_slice %71 {offsets = [4, 64], sizes = [2, 32], strides = [1, 1]} : vector<16x192xf32> to vector<2x32xf32>
    %89 = vector.extract_strided_slice %71 {offsets = [10, 96], sizes = [2, 32], strides = [1, 1]} : vector<16x192xf32> to vector<2x32xf32>
    %90 = vector.extract_strided_slice %71 {offsets = [4, 128], sizes = [2, 32], strides = [1, 1]} : vector<16x192xf32> to vector<2x32xf32>
    %91 = vector.extract_strided_slice %71 {offsets = [10, 160], sizes = [2, 32], strides = [1, 1]} : vector<16x192xf32> to vector<2x32xf32>
    %92 = tpu.concatenate %86, %87, %88, %89, %90, %91 in 1 : vector<2x32xf32>, vector<2x32xf32>, vector<2x32xf32>, vector<2x32xf32>, vector<2x32xf32>, vector<2x32xf32> -> vector<2x192xf32>
    %93 = vector.extract_strided_slice %71 {offsets = [6, 0], sizes = [2, 32], strides = [1, 1]} : vector<16x192xf32> to vector<2x32xf32>
    %94 = vector.extract_strided_slice %71 {offsets = [8, 32], sizes = [2, 32], strides = [1, 1]} : vector<16x192xf32> to vector<2x32xf32>
    %95 = vector.extract_strided_slice %71 {offsets = [6, 64], sizes = [2, 32], strides = [1, 1]} : vector<16x192xf32> to vector<2x32xf32>
    %96 = vector.extract_strided_slice %71 {offsets = [8, 96], sizes = [2, 32], strides = [1, 1]} : vector<16x192xf32> to vector<2x32xf32>
    %97 = vector.extract_strided_slice %71 {offsets = [6, 128], sizes = [2, 32], strides = [1, 1]} : vector<16x192xf32> to vector<2x32xf32>
    %98 = vector.extract_strided_slice %71 {offsets = [8, 160], sizes = [2, 32], strides = [1, 1]} : vector<16x192xf32> to vector<2x32xf32>
    %99 = tpu.concatenate %93, %94, %95, %96, %97, %98 in 1 : vector<2x32xf32>, vector<2x32xf32>, vector<2x32xf32>, vector<2x32xf32>, vector<2x32xf32>, vector<2x32xf32> -> vector<2x192xf32>
    %100 = vector.extract_strided_slice %71 {offsets = [8, 0], sizes = [2, 32], strides = [1, 1]} : vector<16x192xf32> to vector<2x32xf32>
    %101 = vector.extract_strided_slice %71 {offsets = [6, 32], sizes = [2, 32], strides = [1, 1]} : vector<16x192xf32> to vector<2x32xf32>
    %102 = vector.extract_strided_slice %71 {offsets = [8, 64], sizes = [2, 32], strides = [1, 1]} : vector<16x192xf32> to vector<2x32xf32>
    %103 = vector.extract_strided_slice %71 {offsets = [6, 96], sizes = [2, 32], strides = [1, 1]} : vector<16x192xf32> to vector<2x32xf32>
    %104 = vector.extract_strided_slice %71 {offsets = [8, 128], sizes = [2, 32], strides = [1, 1]} : vector<16x192xf32> to vector<2x32xf32>
    %105 = vector.extract_strided_slice %71 {offsets = [6, 160], sizes = [2, 32], strides = [1, 1]} : vector<16x192xf32> to vector<2x32xf32>
    %106 = tpu.concatenate %100, %101, %102, %103, %104, %105 in 1 : vector<2x32xf32>, vector<2x32xf32>, vector<2x32xf32>, vector<2x32xf32>, vector<2x32xf32>, vector<2x32xf32> -> vector<2x192xf32>
    %107 = vector.extract_strided_slice %71 {offsets = [10, 0], sizes = [2, 32], strides = [1, 1]} : vector<16x192xf32> to vector<2x32xf32>
    %108 = vector.extract_strided_slice %71 {offsets = [4, 32], sizes = [2, 32], strides = [1, 1]} : vector<16x192xf32> to vector<2x32xf32>
    %109 = vector.extract_strided_slice %71 {offsets = [10, 64], sizes = [2, 32], strides = [1, 1]} : vector<16x192xf32> to vector<2x32xf32>
    %110 = vector.extract_strided_slice %71 {offsets = [4, 96], sizes = [2, 32], strides = [1, 1]} : vector<16x192xf32> to vector<2x32xf32>
    %111 = vector.extract_strided_slice %71 {offsets = [10, 128], sizes = [2, 32], strides = [1, 1]} : vector<16x192xf32> to vector<2x32xf32>
    %112 = vector.extract_strided_slice %71 {offsets = [4, 160], sizes = [2, 32], strides = [1, 1]} : vector<16x192xf32> to vector<2x32xf32>
    %113 = tpu.concatenate %107, %108, %109, %110, %111, %112 in 1 : vector<2x32xf32>, vector<2x32xf32>, vector<2x32xf32>, vector<2x32xf32>, vector<2x32xf32>, vector<2x32xf32> -> vector<2x192xf32>
    %114 = vector.extract_strided_slice %71 {offsets = [12, 0], sizes = [2, 32], strides = [1, 1]} : vector<16x192xf32> to vector<2x32xf32>
    %115 = vector.extract_strided_slice %71 {offsets = [2, 32], sizes = [2, 32], strides = [1, 1]} : vector<16x192xf32> to vector<2x32xf32>
    %116 = vector.extract_strided_slice %71 {offsets = [12, 64], sizes = [2, 32], strides = [1, 1]} : vector<16x192xf32> to vector<2x32xf32>
    %117 = vector.extract_strided_slice %71 {offsets = [2, 96], sizes = [2, 32], strides = [1, 1]} : vector<16x192xf32> to vector<2x32xf32>
    %118 = vector.extract_strided_slice %71 {offsets = [12, 128], sizes = [2, 32], strides = [1, 1]} : vector<16x192xf32> to vector<2x32xf32>
    %119 = vector.extract_strided_slice %71 {offsets = [2, 160], sizes = [2, 32], strides = [1, 1]} : vector<16x192xf32> to vector<2x32xf32>
    %120 = tpu.concatenate %114, %115, %116, %117, %118, %119 in 1 : vector<2x32xf32>, vector<2x32xf32>, vector<2x32xf32>, vector<2x32xf32>, vector<2x32xf32>, vector<2x32xf32> -> vector<2x192xf32>
    %121 = vector.extract_strided_slice %71 {offsets = [14, 0], sizes = [2, 32], strides = [1, 1]} : vector<16x192xf32> to vector<2x32xf32>
    %122 = vector.extract_strided_slice %71 {offsets = [0, 32], sizes = [2, 32], strides = [1, 1]} : vector<16x192xf32> to vector<2x32xf32>
    %123 = vector.extract_strided_slice %71 {offsets = [14, 64], sizes = [2, 32], strides = [1, 1]} : vector<16x192xf32> to vector<2x32xf32>
    %124 = vector.extract_strided_slice %71 {offsets = [0, 96], sizes = [2, 32], strides = [1, 1]} : vector<16x192xf32> to vector<2x32xf32>
    %125 = vector.extract_strided_slice %71 {offsets = [14, 128], sizes = [2, 32], strides = [1, 1]} : vector<16x192xf32> to vector<2x32xf32>
    %126 = vector.extract_strided_slice %71 {offsets = [0, 160], sizes = [2, 32], strides = [1, 1]} : vector<16x192xf32> to vector<2x32xf32>
    %127 = tpu.concatenate %121, %122, %123, %124, %125, %126 in 1 : vector<2x32xf32>, vector<2x32xf32>, vector<2x32xf32>, vector<2x32xf32>, vector<2x32xf32>, vector<2x32xf32> -> vector<2x192xf32>
    %cst_64 = arith.constant 0.000000e+00 : f32
    %128 = vector.broadcast %cst_64 : f32 to vector<2x64xf32>
    %cst_65 = arith.constant dense<0.000000e+00> : vector<2x192xf32>
    %129 = tpu.matmul %128, %65, %cst_65 {dimension_numbers = #tpu.dot_dimension_numbers<[1], [0], [0], [1], [0, 0, 1, 1], [], []>} : vector<2x64xf32>, vector<64x192xf32>, vector<2x192xf32> -> vector<2x192xf32>
    %130 = vector.broadcast %66 : vector<1x192xf32> to vector<2x192xf32>
    %131 = arith.addf %129, %130 : vector<2x192xf32>
    %132 = vector.extract_strided_slice %78 {offsets = [0, 0], sizes = [2, 128], strides = [1, 1]} : vector<2x192xf32> to vector<2x128xf32>
    %133 = vector.extract_strided_slice %131 {offsets = [0, 0], sizes = [2, 128], strides = [1, 1]} : vector<2x192xf32> to vector<2x128xf32>
    %134 = arith.addf %132, %133 : vector<2x128xf32>
    %135 = arith.negf %134 : vector<2x128xf32>
    %136 = math.exp %135 : vector<2x128xf32>
    %cst_66 = arith.constant 1.000000e+00 : f32
    %137 = vector.broadcast %cst_66 : f32 to vector<2x128xf32>
    %138 = arith.addf %137, %136 : vector<2x128xf32>
    %139 = arith.divf %137, %138 : vector<2x128xf32>
    %140 = vector.extract_strided_slice %139 {offsets = [0, 0], sizes = [2, 64], strides = [1, 1]} : vector<2x128xf32> to vector<2x64xf32>
    %141 = vector.extract_strided_slice %139 {offsets = [0, 64], sizes = [2, 64], strides = [1, 1]} : vector<2x128xf32> to vector<2x64xf32>
    %142 = vector.extract_strided_slice %78 {offsets = [0, 128], sizes = [2, 64], strides = [1, 1]} : vector<2x192xf32> to vector<2x64xf32>
    %143 = vector.extract_strided_slice %131 {offsets = [0, 128], sizes = [2, 64], strides = [1, 1]} : vector<2x192xf32> to vector<2x64xf32>
    %144 = arith.mulf %140, %143 : vector<2x64xf32>
    %145 = arith.addf %142, %144 : vector<2x64xf32>
    %146 = math.tanh %145 : vector<2x64xf32>
    %cst_67 = arith.constant 1.000000e+00 : f32
    %147 = vector.broadcast %cst_67 : f32 to vector<2x64xf32>
    %148 = arith.subf %147, %141 : vector<2x64xf32>
    %149 = arith.mulf %148, %146 : vector<2x64xf32>
    %150 = arith.mulf %141, %128 : vector<2x64xf32>
    %151 = arith.addf %149, %150 : vector<2x64xf32>
    %152 = vector.extract_strided_slice %151 {offsets = [0, 0], sizes = [2, 32], strides = [1, 1]} : vector<2x64xf32> to vector<2x32xf32>
    %153 = vector.extract_strided_slice %151 {offsets = [0, 32], sizes = [2, 32], strides = [1, 1]} : vector<2x64xf32> to vector<2x32xf32>
    %cst_68 = arith.constant dense<0.000000e+00> : vector<2x192xf32>
    %154 = tpu.matmul %151, %65, %cst_68 {dimension_numbers = #tpu.dot_dimension_numbers<[1], [0], [0], [1], [0, 0, 1, 1], [], []>} : vector<2x64xf32>, vector<64x192xf32>, vector<2x192xf32> -> vector<2x192xf32>
    %155 = vector.broadcast %66 : vector<1x192xf32> to vector<2x192xf32>
    %156 = arith.addf %154, %155 : vector<2x192xf32>
    %157 = vector.extract_strided_slice %85 {offsets = [0, 0], sizes = [2, 128], strides = [1, 1]} : vector<2x192xf32> to vector<2x128xf32>
    %158 = vector.extract_strided_slice %156 {offsets = [0, 0], sizes = [2, 128], strides = [1, 1]} : vector<2x192xf32> to vector<2x128xf32>
    %159 = arith.addf %157, %158 : vector<2x128xf32>
    %160 = arith.negf %159 : vector<2x128xf32>
    %161 = math.exp %160 : vector<2x128xf32>
    %cst_69 = arith.constant 1.000000e+00 : f32
    %162 = vector.broadcast %cst_69 : f32 to vector<2x128xf32>
    %163 = arith.addf %162, %161 : vector<2x128xf32>
    %164 = arith.divf %162, %163 : vector<2x128xf32>
    %165 = vector.extract_strided_slice %164 {offsets = [0, 0], sizes = [2, 64], strides = [1, 1]} : vector<2x128xf32> to vector<2x64xf32>
    %166 = vector.extract_strided_slice %164 {offsets = [0, 64], sizes = [2, 64], strides = [1, 1]} : vector<2x128xf32> to vector<2x64xf32>
    %167 = vector.extract_strided_slice %85 {offsets = [0, 128], sizes = [2, 64], strides = [1, 1]} : vector<2x192xf32> to vector<2x64xf32>
    %168 = vector.extract_strided_slice %156 {offsets = [0, 128], sizes = [2, 64], strides = [1, 1]} : vector<2x192xf32> to vector<2x64xf32>
    %169 = arith.mulf %165, %168 : vector<2x64xf32>
    %170 = arith.addf %167, %169 : vector<2x64xf32>
    %171 = math.tanh %170 : vector<2x64xf32>
    %cst_70 = arith.constant 1.000000e+00 : f32
    %172 = vector.broadcast %cst_70 : f32 to vector<2x64xf32>
    %173 = arith.subf %172, %166 : vector<2x64xf32>
    %174 = arith.mulf %173, %171 : vector<2x64xf32>
    %175 = arith.mulf %166, %151 : vector<2x64xf32>
    %176 = arith.addf %174, %175 : vector<2x64xf32>
    %177 = vector.extract_strided_slice %176 {offsets = [0, 0], sizes = [2, 32], strides = [1, 1]} : vector<2x64xf32> to vector<2x32xf32>
    %178 = vector.extract_strided_slice %176 {offsets = [0, 32], sizes = [2, 32], strides = [1, 1]} : vector<2x64xf32> to vector<2x32xf32>
    %cst_71 = arith.constant dense<0.000000e+00> : vector<2x192xf32>
    %179 = tpu.matmul %176, %65, %cst_71 {dimension_numbers = #tpu.dot_dimension_numbers<[1], [0], [0], [1], [0, 0, 1, 1], [], []>} : vector<2x64xf32>, vector<64x192xf32>, vector<2x192xf32> -> vector<2x192xf32>
    %180 = vector.broadcast %66 : vector<1x192xf32> to vector<2x192xf32>
    %181 = arith.addf %179, %180 : vector<2x192xf32>
    %182 = vector.extract_strided_slice %92 {offsets = [0, 0], sizes = [2, 128], strides = [1, 1]} : vector<2x192xf32> to vector<2x128xf32>
    %183 = vector.extract_strided_slice %181 {offsets = [0, 0], sizes = [2, 128], strides = [1, 1]} : vector<2x192xf32> to vector<2x128xf32>
    %184 = arith.addf %182, %183 : vector<2x128xf32>
    %185 = arith.negf %184 : vector<2x128xf32>
    %186 = math.exp %185 : vector<2x128xf32>
    %cst_72 = arith.constant 1.000000e+00 : f32
    %187 = vector.broadcast %cst_72 : f32 to vector<2x128xf32>
    %188 = arith.addf %187, %186 : vector<2x128xf32>
    %189 = arith.divf %187, %188 : vector<2x128xf32>
    %190 = vector.extract_strided_slice %189 {offsets = [0, 0], sizes = [2, 64], strides = [1, 1]} : vector<2x128xf32> to vector<2x64xf32>
    %191 = vector.extract_strided_slice %189 {offsets = [0, 64], sizes = [2, 64], strides = [1, 1]} : vector<2x128xf32> to vector<2x64xf32>
    %192 = vector.extract_strided_slice %92 {offsets = [0, 128], sizes = [2, 64], strides = [1, 1]} : vector<2x192xf32> to vector<2x64xf32>
    %193 = vector.extract_strided_slice %181 {offsets = [0, 128], sizes = [2, 64], strides = [1, 1]} : vector<2x192xf32> to vector<2x64xf32>
    %194 = arith.mulf %190, %193 : vector<2x64xf32>
    %195 = arith.addf %192, %194 : vector<2x64xf32>
    %196 = math.tanh %195 : vector<2x64xf32>
    %cst_73 = arith.constant 1.000000e+00 : f32
    %197 = vector.broadcast %cst_73 : f32 to vector<2x64xf32>
    %198 = arith.subf %197, %191 : vector<2x64xf32>
    %199 = arith.mulf %198, %196 : vector<2x64xf32>
    %200 = arith.mulf %191, %176 : vector<2x64xf32>
    %201 = arith.addf %199, %200 : vector<2x64xf32>
    %202 = vector.extract_strided_slice %201 {offsets = [0, 0], sizes = [2, 32], strides = [1, 1]} : vector<2x64xf32> to vector<2x32xf32>
    %203 = vector.extract_strided_slice %201 {offsets = [0, 32], sizes = [2, 32], strides = [1, 1]} : vector<2x64xf32> to vector<2x32xf32>
    %cst_74 = arith.constant dense<0.000000e+00> : vector<2x192xf32>
    %204 = tpu.matmul %201, %65, %cst_74 {dimension_numbers = #tpu.dot_dimension_numbers<[1], [0], [0], [1], [0, 0, 1, 1], [], []>} : vector<2x64xf32>, vector<64x192xf32>, vector<2x192xf32> -> vector<2x192xf32>
    %205 = vector.broadcast %66 : vector<1x192xf32> to vector<2x192xf32>
    %206 = arith.addf %204, %205 : vector<2x192xf32>
    %207 = vector.extract_strided_slice %99 {offsets = [0, 0], sizes = [2, 128], strides = [1, 1]} : vector<2x192xf32> to vector<2x128xf32>
    %208 = vector.extract_strided_slice %206 {offsets = [0, 0], sizes = [2, 128], strides = [1, 1]} : vector<2x192xf32> to vector<2x128xf32>
    %209 = arith.addf %207, %208 : vector<2x128xf32>
    %210 = arith.negf %209 : vector<2x128xf32>
    %211 = math.exp %210 : vector<2x128xf32>
    %cst_75 = arith.constant 1.000000e+00 : f32
    %212 = vector.broadcast %cst_75 : f32 to vector<2x128xf32>
    %213 = arith.addf %212, %211 : vector<2x128xf32>
    %214 = arith.divf %212, %213 : vector<2x128xf32>
    %215 = vector.extract_strided_slice %214 {offsets = [0, 0], sizes = [2, 64], strides = [1, 1]} : vector<2x128xf32> to vector<2x64xf32>
    %216 = vector.extract_strided_slice %214 {offsets = [0, 64], sizes = [2, 64], strides = [1, 1]} : vector<2x128xf32> to vector<2x64xf32>
    %217 = vector.extract_strided_slice %99 {offsets = [0, 128], sizes = [2, 64], strides = [1, 1]} : vector<2x192xf32> to vector<2x64xf32>
    %218 = vector.extract_strided_slice %206 {offsets = [0, 128], sizes = [2, 64], strides = [1, 1]} : vector<2x192xf32> to vector<2x64xf32>
    %219 = arith.mulf %215, %218 : vector<2x64xf32>
    %220 = arith.addf %217, %219 : vector<2x64xf32>
    %221 = math.tanh %220 : vector<2x64xf32>
    %cst_76 = arith.constant 1.000000e+00 : f32
    %222 = vector.broadcast %cst_76 : f32 to vector<2x64xf32>
    %223 = arith.subf %222, %216 : vector<2x64xf32>
    %224 = arith.mulf %223, %221 : vector<2x64xf32>
    %225 = arith.mulf %216, %201 : vector<2x64xf32>
    %226 = arith.addf %224, %225 : vector<2x64xf32>
    %227 = vector.extract_strided_slice %226 {offsets = [0, 0], sizes = [2, 32], strides = [1, 1]} : vector<2x64xf32> to vector<2x32xf32>
    %228 = vector.extract_strided_slice %226 {offsets = [0, 32], sizes = [2, 32], strides = [1, 1]} : vector<2x64xf32> to vector<2x32xf32>
    %cst_77 = arith.constant dense<0.000000e+00> : vector<2x192xf32>
    %229 = tpu.matmul %226, %65, %cst_77 {dimension_numbers = #tpu.dot_dimension_numbers<[1], [0], [0], [1], [0, 0, 1, 1], [], []>} : vector<2x64xf32>, vector<64x192xf32>, vector<2x192xf32> -> vector<2x192xf32>
    %230 = vector.broadcast %66 : vector<1x192xf32> to vector<2x192xf32>
    %231 = arith.addf %229, %230 : vector<2x192xf32>
    %232 = vector.extract_strided_slice %106 {offsets = [0, 0], sizes = [2, 128], strides = [1, 1]} : vector<2x192xf32> to vector<2x128xf32>
    %233 = vector.extract_strided_slice %231 {offsets = [0, 0], sizes = [2, 128], strides = [1, 1]} : vector<2x192xf32> to vector<2x128xf32>
    %234 = arith.addf %232, %233 : vector<2x128xf32>
    %235 = arith.negf %234 : vector<2x128xf32>
    %236 = math.exp %235 : vector<2x128xf32>
    %cst_78 = arith.constant 1.000000e+00 : f32
    %237 = vector.broadcast %cst_78 : f32 to vector<2x128xf32>
    %238 = arith.addf %237, %236 : vector<2x128xf32>
    %239 = arith.divf %237, %238 : vector<2x128xf32>
    %240 = vector.extract_strided_slice %239 {offsets = [0, 0], sizes = [2, 64], strides = [1, 1]} : vector<2x128xf32> to vector<2x64xf32>
    %241 = vector.extract_strided_slice %239 {offsets = [0, 64], sizes = [2, 64], strides = [1, 1]} : vector<2x128xf32> to vector<2x64xf32>
    %242 = vector.extract_strided_slice %106 {offsets = [0, 128], sizes = [2, 64], strides = [1, 1]} : vector<2x192xf32> to vector<2x64xf32>
    %243 = vector.extract_strided_slice %231 {offsets = [0, 128], sizes = [2, 64], strides = [1, 1]} : vector<2x192xf32> to vector<2x64xf32>
    %244 = arith.mulf %240, %243 : vector<2x64xf32>
    %245 = arith.addf %242, %244 : vector<2x64xf32>
    %246 = math.tanh %245 : vector<2x64xf32>
    %cst_79 = arith.constant 1.000000e+00 : f32
    %247 = vector.broadcast %cst_79 : f32 to vector<2x64xf32>
    %248 = arith.subf %247, %241 : vector<2x64xf32>
    %249 = arith.mulf %248, %246 : vector<2x64xf32>
    %250 = arith.mulf %241, %226 : vector<2x64xf32>
    %251 = arith.addf %249, %250 : vector<2x64xf32>
    %252 = vector.extract_strided_slice %251 {offsets = [0, 0], sizes = [2, 32], strides = [1, 1]} : vector<2x64xf32> to vector<2x32xf32>
    %253 = vector.extract_strided_slice %251 {offsets = [0, 32], sizes = [2, 32], strides = [1, 1]} : vector<2x64xf32> to vector<2x32xf32>
    %cst_80 = arith.constant dense<0.000000e+00> : vector<2x192xf32>
    %254 = tpu.matmul %251, %65, %cst_80 {dimension_numbers = #tpu.dot_dimension_numbers<[1], [0], [0], [1], [0, 0, 1, 1], [], []>} : vector<2x64xf32>, vector<64x192xf32>, vector<2x192xf32> -> vector<2x192xf32>
    %255 = vector.broadcast %66 : vector<1x192xf32> to vector<2x192xf32>
    %256 = arith.addf %254, %255 : vector<2x192xf32>
    %257 = vector.extract_strided_slice %113 {offsets = [0, 0], sizes = [2, 128], strides = [1, 1]} : vector<2x192xf32> to vector<2x128xf32>
    %258 = vector.extract_strided_slice %256 {offsets = [0, 0], sizes = [2, 128], strides = [1, 1]} : vector<2x192xf32> to vector<2x128xf32>
    %259 = arith.addf %257, %258 : vector<2x128xf32>
    %260 = arith.negf %259 : vector<2x128xf32>
    %261 = math.exp %260 : vector<2x128xf32>
    %cst_81 = arith.constant 1.000000e+00 : f32
    %262 = vector.broadcast %cst_81 : f32 to vector<2x128xf32>
    %263 = arith.addf %262, %261 : vector<2x128xf32>
    %264 = arith.divf %262, %263 : vector<2x128xf32>
    %265 = vector.extract_strided_slice %264 {offsets = [0, 0], sizes = [2, 64], strides = [1, 1]} : vector<2x128xf32> to vector<2x64xf32>
    %266 = vector.extract_strided_slice %264 {offsets = [0, 64], sizes = [2, 64], strides = [1, 1]} : vector<2x128xf32> to vector<2x64xf32>
    %267 = vector.extract_strided_slice %113 {offsets = [0, 128], sizes = [2, 64], strides = [1, 1]} : vector<2x192xf32> to vector<2x64xf32>
    %268 = vector.extract_strided_slice %256 {offsets = [0, 128], sizes = [2, 64], strides = [1, 1]} : vector<2x192xf32> to vector<2x64xf32>
    %269 = arith.mulf %265, %268 : vector<2x64xf32>
    %270 = arith.addf %267, %269 : vector<2x64xf32>
    %271 = math.tanh %270 : vector<2x64xf32>
    %cst_82 = arith.constant 1.000000e+00 : f32
    %272 = vector.broadcast %cst_82 : f32 to vector<2x64xf32>
    %273 = arith.subf %272, %266 : vector<2x64xf32>
    %274 = arith.mulf %273, %271 : vector<2x64xf32>
    %275 = arith.mulf %266, %251 : vector<2x64xf32>
    %276 = arith.addf %274, %275 : vector<2x64xf32>
    %277 = vector.extract_strided_slice %276 {offsets = [0, 0], sizes = [2, 32], strides = [1, 1]} : vector<2x64xf32> to vector<2x32xf32>
    %278 = vector.extract_strided_slice %276 {offsets = [0, 32], sizes = [2, 32], strides = [1, 1]} : vector<2x64xf32> to vector<2x32xf32>
    %cst_83 = arith.constant dense<0.000000e+00> : vector<2x192xf32>
    %279 = tpu.matmul %276, %65, %cst_83 {dimension_numbers = #tpu.dot_dimension_numbers<[1], [0], [0], [1], [0, 0, 1, 1], [], []>} : vector<2x64xf32>, vector<64x192xf32>, vector<2x192xf32> -> vector<2x192xf32>
    %280 = vector.broadcast %66 : vector<1x192xf32> to vector<2x192xf32>
    %281 = arith.addf %279, %280 : vector<2x192xf32>
    %282 = vector.extract_strided_slice %120 {offsets = [0, 0], sizes = [2, 128], strides = [1, 1]} : vector<2x192xf32> to vector<2x128xf32>
    %283 = vector.extract_strided_slice %281 {offsets = [0, 0], sizes = [2, 128], strides = [1, 1]} : vector<2x192xf32> to vector<2x128xf32>
    %284 = arith.addf %282, %283 : vector<2x128xf32>
    %285 = arith.negf %284 : vector<2x128xf32>
    %286 = math.exp %285 : vector<2x128xf32>
    %cst_84 = arith.constant 1.000000e+00 : f32
    %287 = vector.broadcast %cst_84 : f32 to vector<2x128xf32>
    %288 = arith.addf %287, %286 : vector<2x128xf32>
    %289 = arith.divf %287, %288 : vector<2x128xf32>
    %290 = vector.extract_strided_slice %289 {offsets = [0, 0], sizes = [2, 64], strides = [1, 1]} : vector<2x128xf32> to vector<2x64xf32>
    %291 = vector.extract_strided_slice %289 {offsets = [0, 64], sizes = [2, 64], strides = [1, 1]} : vector<2x128xf32> to vector<2x64xf32>
    %292 = vector.extract_strided_slice %120 {offsets = [0, 128], sizes = [2, 64], strides = [1, 1]} : vector<2x192xf32> to vector<2x64xf32>
    %293 = vector.extract_strided_slice %281 {offsets = [0, 128], sizes = [2, 64], strides = [1, 1]} : vector<2x192xf32> to vector<2x64xf32>
    %294 = arith.mulf %290, %293 : vector<2x64xf32>
    %295 = arith.addf %292, %294 : vector<2x64xf32>
    %296 = math.tanh %295 : vector<2x64xf32>
    %cst_85 = arith.constant 1.000000e+00 : f32
    %297 = vector.broadcast %cst_85 : f32 to vector<2x64xf32>
    %298 = arith.subf %297, %291 : vector<2x64xf32>
    %299 = arith.mulf %298, %296 : vector<2x64xf32>
    %300 = arith.mulf %291, %276 : vector<2x64xf32>
    %301 = arith.addf %299, %300 : vector<2x64xf32>
    %302 = vector.extract_strided_slice %301 {offsets = [0, 0], sizes = [2, 32], strides = [1, 1]} : vector<2x64xf32> to vector<2x32xf32>
    %303 = vector.extract_strided_slice %301 {offsets = [0, 32], sizes = [2, 32], strides = [1, 1]} : vector<2x64xf32> to vector<2x32xf32>
    %cst_86 = arith.constant dense<0.000000e+00> : vector<2x192xf32>
    %304 = tpu.matmul %301, %65, %cst_86 {dimension_numbers = #tpu.dot_dimension_numbers<[1], [0], [0], [1], [0, 0, 1, 1], [], []>} : vector<2x64xf32>, vector<64x192xf32>, vector<2x192xf32> -> vector<2x192xf32>
    %305 = vector.broadcast %66 : vector<1x192xf32> to vector<2x192xf32>
    %306 = arith.addf %304, %305 : vector<2x192xf32>
    %307 = vector.extract_strided_slice %127 {offsets = [0, 0], sizes = [2, 128], strides = [1, 1]} : vector<2x192xf32> to vector<2x128xf32>
    %308 = vector.extract_strided_slice %306 {offsets = [0, 0], sizes = [2, 128], strides = [1, 1]} : vector<2x192xf32> to vector<2x128xf32>
    %309 = arith.addf %307, %308 : vector<2x128xf32>
    %310 = arith.negf %309 : vector<2x128xf32>
    %311 = math.exp %310 : vector<2x128xf32>
    %cst_87 = arith.constant 1.000000e+00 : f32
    %312 = vector.broadcast %cst_87 : f32 to vector<2x128xf32>
    %313 = arith.addf %312, %311 : vector<2x128xf32>
    %314 = arith.divf %312, %313 : vector<2x128xf32>
    %315 = vector.extract_strided_slice %314 {offsets = [0, 0], sizes = [2, 64], strides = [1, 1]} : vector<2x128xf32> to vector<2x64xf32>
    %316 = vector.extract_strided_slice %314 {offsets = [0, 64], sizes = [2, 64], strides = [1, 1]} : vector<2x128xf32> to vector<2x64xf32>
    %317 = vector.extract_strided_slice %127 {offsets = [0, 128], sizes = [2, 64], strides = [1, 1]} : vector<2x192xf32> to vector<2x64xf32>
    %318 = vector.extract_strided_slice %306 {offsets = [0, 128], sizes = [2, 64], strides = [1, 1]} : vector<2x192xf32> to vector<2x64xf32>
    %319 = arith.mulf %315, %318 : vector<2x64xf32>
    %320 = arith.addf %317, %319 : vector<2x64xf32>
    %321 = math.tanh %320 : vector<2x64xf32>
    %cst_88 = arith.constant 1.000000e+00 : f32
    %322 = vector.broadcast %cst_88 : f32 to vector<2x64xf32>
    %323 = arith.subf %322, %316 : vector<2x64xf32>
    %324 = arith.mulf %323, %321 : vector<2x64xf32>
    %325 = arith.mulf %316, %301 : vector<2x64xf32>
    %326 = arith.addf %324, %325 : vector<2x64xf32>
    %327 = vector.extract_strided_slice %326 {offsets = [0, 0], sizes = [2, 32], strides = [1, 1]} : vector<2x64xf32> to vector<2x32xf32>
    %328 = vector.extract_strided_slice %326 {offsets = [0, 32], sizes = [2, 32], strides = [1, 1]} : vector<2x64xf32> to vector<2x32xf32>
    %329 = tpu.concatenate %152, %177, %202, %227, %252, %277, %302, %327 in 0 : vector<2x32xf32>, vector<2x32xf32>, vector<2x32xf32>, vector<2x32xf32>, vector<2x32xf32>, vector<2x32xf32>, vector<2x32xf32>, vector<2x32xf32> -> vector<16x32xf32>
    %330 = tpu.concatenate %328, %303, %278, %253, %228, %203, %178, %153 in 0 : vector<2x32xf32>, vector<2x32xf32>, vector<2x32xf32>, vector<2x32xf32>, vector<2x32xf32>, vector<2x32xf32>, vector<2x32xf32>, vector<2x32xf32> -> vector<16x32xf32>
    %331 = tpu.concatenate %329, %330 in 1 : vector<16x32xf32>, vector<16x32xf32> -> vector<16x64xf32>
    %c0_89 = arith.constant 0 : index
    %c0_90 = arith.constant 0 : index
    %332 = vector.load %arg8[%c0_89, %c0_90] : memref<32x96xf32, #tpu.memory_space<vmem>>, vector<32x96xf32>
    %c0_91 = arith.constant 0 : index
    %c0_92 = arith.constant 0 : index
    %333 = vector.load %arg9[%c0_91, %c0_92] : memref<1x96xf32, #tpu.memory_space<vmem>>, vector<1x96xf32>
    %c0_93 = arith.constant 0 : index
    %c0_94 = arith.constant 0 : index
    %334 = vector.load %arg6[%c0_93, %c0_94] : memref<64x96xf32, #tpu.memory_space<vmem>>, vector<64x96xf32>
    %cst_95 = arith.constant dense<0.000000e+00> : vector<16x96xf32>
    %335 = tpu.matmul %331, %334, %cst_95 {dimension_numbers = #tpu.dot_dimension_numbers<[1], [0], [0], [1], [0, 0, 1, 1], [], []>} : vector<16x64xf32>, vector<64x96xf32>, vector<16x96xf32> -> vector<16x96xf32>
    %c0_96 = arith.constant 0 : index
    %c0_97 = arith.constant 0 : index
    %336 = vector.load %arg7[%c0_96, %c0_97] : memref<1x96xf32, #tpu.memory_space<vmem>>, vector<1x96xf32>
    %337 = vector.broadcast %336 : vector<1x96xf32> to vector<16x96xf32>
    %338 = arith.addf %335, %337 : vector<16x96xf32>
    %cst_98 = arith.constant 0.000000e+00 : f32
    %339 = vector.broadcast %cst_98 : f32 to vector<2x32xf32>
    %cst_99 = arith.constant dense<0.000000e+00> : vector<2x96xf32>
    %340 = tpu.matmul %339, %332, %cst_99 {dimension_numbers = #tpu.dot_dimension_numbers<[1], [0], [0], [1], [0, 0, 1, 1], [], []>} : vector<2x32xf32>, vector<32x96xf32>, vector<2x96xf32> -> vector<2x96xf32>
    %341 = vector.broadcast %333 : vector<1x96xf32> to vector<2x96xf32>
    %342 = arith.addf %340, %341 : vector<2x96xf32>
    %343 = vector.extract_strided_slice %338 {offsets = [14, 0], sizes = [2, 96], strides = [1, 1]} : vector<16x96xf32> to vector<2x96xf32>
    %344 = vector.extract_strided_slice %343 {offsets = [0, 0], sizes = [2, 64], strides = [1, 1]} : vector<2x96xf32> to vector<2x64xf32>
    %345 = vector.extract_strided_slice %342 {offsets = [0, 0], sizes = [2, 64], strides = [1, 1]} : vector<2x96xf32> to vector<2x64xf32>
    %346 = arith.addf %344, %345 : vector<2x64xf32>
    %347 = arith.negf %346 : vector<2x64xf32>
    %348 = math.exp %347 : vector<2x64xf32>
    %cst_100 = arith.constant 1.000000e+00 : f32
    %349 = vector.broadcast %cst_100 : f32 to vector<2x64xf32>
    %350 = arith.addf %349, %348 : vector<2x64xf32>
    %351 = arith.divf %349, %350 : vector<2x64xf32>
    %352 = vector.extract_strided_slice %343 {offsets = [0, 64], sizes = [2, 32], strides = [1, 1]} : vector<2x96xf32> to vector<2x32xf32>
    %353 = vector.extract_strided_slice %351 {offsets = [0, 0], sizes = [2, 32], strides = [1, 1]} : vector<2x64xf32> to vector<2x32xf32>
    %354 = vector.extract_strided_slice %342 {offsets = [0, 64], sizes = [2, 32], strides = [1, 1]} : vector<2x96xf32> to vector<2x32xf32>
    %355 = arith.mulf %353, %354 : vector<2x32xf32>
    %356 = arith.addf %352, %355 : vector<2x32xf32>
    %357 = math.tanh %356 : vector<2x32xf32>
    %358 = vector.extract_strided_slice %351 {offsets = [0, 32], sizes = [2, 32], strides = [1, 1]} : vector<2x64xf32> to vector<2x32xf32>
    %cst_101 = arith.constant 1.000000e+00 : f32
    %359 = vector.broadcast %cst_101 : f32 to vector<2x32xf32>
    %360 = arith.subf %359, %358 : vector<2x32xf32>
    %361 = arith.mulf %360, %357 : vector<2x32xf32>
    %362 = vector.extract_strided_slice %351 {offsets = [0, 32], sizes = [2, 32], strides = [1, 1]} : vector<2x64xf32> to vector<2x32xf32>
    %363 = arith.mulf %362, %339 : vector<2x32xf32>
    %364 = arith.addf %361, %363 : vector<2x32xf32>
    %cst_102 = arith.constant dense<0.000000e+00> : vector<2x96xf32>
    %365 = tpu.matmul %364, %332, %cst_102 {dimension_numbers = #tpu.dot_dimension_numbers<[1], [0], [0], [1], [0, 0, 1, 1], [], []>} : vector<2x32xf32>, vector<32x96xf32>, vector<2x96xf32> -> vector<2x96xf32>
    %366 = vector.broadcast %333 : vector<1x96xf32> to vector<2x96xf32>
    %367 = arith.addf %365, %366 : vector<2x96xf32>
    %368 = vector.extract_strided_slice %338 {offsets = [12, 0], sizes = [2, 96], strides = [1, 1]} : vector<16x96xf32> to vector<2x96xf32>
    %369 = vector.extract_strided_slice %368 {offsets = [0, 0], sizes = [2, 64], strides = [1, 1]} : vector<2x96xf32> to vector<2x64xf32>
    %370 = vector.extract_strided_slice %367 {offsets = [0, 0], sizes = [2, 64], strides = [1, 1]} : vector<2x96xf32> to vector<2x64xf32>
    %371 = arith.addf %369, %370 : vector<2x64xf32>
    %372 = arith.negf %371 : vector<2x64xf32>
    %373 = math.exp %372 : vector<2x64xf32>
    %cst_103 = arith.constant 1.000000e+00 : f32
    %374 = vector.broadcast %cst_103 : f32 to vector<2x64xf32>
    %375 = arith.addf %374, %373 : vector<2x64xf32>
    %376 = arith.divf %374, %375 : vector<2x64xf32>
    %377 = vector.extract_strided_slice %368 {offsets = [0, 64], sizes = [2, 32], strides = [1, 1]} : vector<2x96xf32> to vector<2x32xf32>
    %378 = vector.extract_strided_slice %376 {offsets = [0, 0], sizes = [2, 32], strides = [1, 1]} : vector<2x64xf32> to vector<2x32xf32>
    %379 = vector.extract_strided_slice %367 {offsets = [0, 64], sizes = [2, 32], strides = [1, 1]} : vector<2x96xf32> to vector<2x32xf32>
    %380 = arith.mulf %378, %379 : vector<2x32xf32>
    %381 = arith.addf %377, %380 : vector<2x32xf32>
    %382 = math.tanh %381 : vector<2x32xf32>
    %383 = vector.extract_strided_slice %376 {offsets = [0, 32], sizes = [2, 32], strides = [1, 1]} : vector<2x64xf32> to vector<2x32xf32>
    %cst_104 = arith.constant 1.000000e+00 : f32
    %384 = vector.broadcast %cst_104 : f32 to vector<2x32xf32>
    %385 = arith.subf %384, %383 : vector<2x32xf32>
    %386 = arith.mulf %385, %382 : vector<2x32xf32>
    %387 = vector.extract_strided_slice %376 {offsets = [0, 32], sizes = [2, 32], strides = [1, 1]} : vector<2x64xf32> to vector<2x32xf32>
    %388 = arith.mulf %387, %364 : vector<2x32xf32>
    %389 = arith.addf %386, %388 : vector<2x32xf32>
    %cst_105 = arith.constant dense<0.000000e+00> : vector<2x96xf32>
    %390 = tpu.matmul %389, %332, %cst_105 {dimension_numbers = #tpu.dot_dimension_numbers<[1], [0], [0], [1], [0, 0, 1, 1], [], []>} : vector<2x32xf32>, vector<32x96xf32>, vector<2x96xf32> -> vector<2x96xf32>
    %391 = vector.broadcast %333 : vector<1x96xf32> to vector<2x96xf32>
    %392 = arith.addf %390, %391 : vector<2x96xf32>
    %393 = vector.extract_strided_slice %338 {offsets = [10, 0], sizes = [2, 96], strides = [1, 1]} : vector<16x96xf32> to vector<2x96xf32>
    %394 = vector.extract_strided_slice %393 {offsets = [0, 0], sizes = [2, 64], strides = [1, 1]} : vector<2x96xf32> to vector<2x64xf32>
    %395 = vector.extract_strided_slice %392 {offsets = [0, 0], sizes = [2, 64], strides = [1, 1]} : vector<2x96xf32> to vector<2x64xf32>
    %396 = arith.addf %394, %395 : vector<2x64xf32>
    %397 = arith.negf %396 : vector<2x64xf32>
    %398 = math.exp %397 : vector<2x64xf32>
    %cst_106 = arith.constant 1.000000e+00 : f32
    %399 = vector.broadcast %cst_106 : f32 to vector<2x64xf32>
    %400 = arith.addf %399, %398 : vector<2x64xf32>
    %401 = arith.divf %399, %400 : vector<2x64xf32>
    %402 = vector.extract_strided_slice %393 {offsets = [0, 64], sizes = [2, 32], strides = [1, 1]} : vector<2x96xf32> to vector<2x32xf32>
    %403 = vector.extract_strided_slice %401 {offsets = [0, 0], sizes = [2, 32], strides = [1, 1]} : vector<2x64xf32> to vector<2x32xf32>
    %404 = vector.extract_strided_slice %392 {offsets = [0, 64], sizes = [2, 32], strides = [1, 1]} : vector<2x96xf32> to vector<2x32xf32>
    %405 = arith.mulf %403, %404 : vector<2x32xf32>
    %406 = arith.addf %402, %405 : vector<2x32xf32>
    %407 = math.tanh %406 : vector<2x32xf32>
    %408 = vector.extract_strided_slice %401 {offsets = [0, 32], sizes = [2, 32], strides = [1, 1]} : vector<2x64xf32> to vector<2x32xf32>
    %cst_107 = arith.constant 1.000000e+00 : f32
    %409 = vector.broadcast %cst_107 : f32 to vector<2x32xf32>
    %410 = arith.subf %409, %408 : vector<2x32xf32>
    %411 = arith.mulf %410, %407 : vector<2x32xf32>
    %412 = vector.extract_strided_slice %401 {offsets = [0, 32], sizes = [2, 32], strides = [1, 1]} : vector<2x64xf32> to vector<2x32xf32>
    %413 = arith.mulf %412, %389 : vector<2x32xf32>
    %414 = arith.addf %411, %413 : vector<2x32xf32>
    %cst_108 = arith.constant dense<0.000000e+00> : vector<2x96xf32>
    %415 = tpu.matmul %414, %332, %cst_108 {dimension_numbers = #tpu.dot_dimension_numbers<[1], [0], [0], [1], [0, 0, 1, 1], [], []>} : vector<2x32xf32>, vector<32x96xf32>, vector<2x96xf32> -> vector<2x96xf32>
    %416 = vector.broadcast %333 : vector<1x96xf32> to vector<2x96xf32>
    %417 = arith.addf %415, %416 : vector<2x96xf32>
    %418 = vector.extract_strided_slice %338 {offsets = [8, 0], sizes = [2, 96], strides = [1, 1]} : vector<16x96xf32> to vector<2x96xf32>
    %419 = vector.extract_strided_slice %418 {offsets = [0, 0], sizes = [2, 64], strides = [1, 1]} : vector<2x96xf32> to vector<2x64xf32>
    %420 = vector.extract_strided_slice %417 {offsets = [0, 0], sizes = [2, 64], strides = [1, 1]} : vector<2x96xf32> to vector<2x64xf32>
    %421 = arith.addf %419, %420 : vector<2x64xf32>
    %422 = arith.negf %421 : vector<2x64xf32>
    %423 = math.exp %422 : vector<2x64xf32>
    %cst_109 = arith.constant 1.000000e+00 : f32
    %424 = vector.broadcast %cst_109 : f32 to vector<2x64xf32>
    %425 = arith.addf %424, %423 : vector<2x64xf32>
    %426 = arith.divf %424, %425 : vector<2x64xf32>
    %427 = vector.extract_strided_slice %418 {offsets = [0, 64], sizes = [2, 32], strides = [1, 1]} : vector<2x96xf32> to vector<2x32xf32>
    %428 = vector.extract_strided_slice %426 {offsets = [0, 0], sizes = [2, 32], strides = [1, 1]} : vector<2x64xf32> to vector<2x32xf32>
    %429 = vector.extract_strided_slice %417 {offsets = [0, 64], sizes = [2, 32], strides = [1, 1]} : vector<2x96xf32> to vector<2x32xf32>
    %430 = arith.mulf %428, %429 : vector<2x32xf32>
    %431 = arith.addf %427, %430 : vector<2x32xf32>
    %432 = math.tanh %431 : vector<2x32xf32>
    %433 = vector.extract_strided_slice %426 {offsets = [0, 32], sizes = [2, 32], strides = [1, 1]} : vector<2x64xf32> to vector<2x32xf32>
    %cst_110 = arith.constant 1.000000e+00 : f32
    %434 = vector.broadcast %cst_110 : f32 to vector<2x32xf32>
    %435 = arith.subf %434, %433 : vector<2x32xf32>
    %436 = arith.mulf %435, %432 : vector<2x32xf32>
    %437 = vector.extract_strided_slice %426 {offsets = [0, 32], sizes = [2, 32], strides = [1, 1]} : vector<2x64xf32> to vector<2x32xf32>
    %438 = arith.mulf %437, %414 : vector<2x32xf32>
    %439 = arith.addf %436, %438 : vector<2x32xf32>
    %cst_111 = arith.constant dense<0.000000e+00> : vector<2x96xf32>
    %440 = tpu.matmul %439, %332, %cst_111 {dimension_numbers = #tpu.dot_dimension_numbers<[1], [0], [0], [1], [0, 0, 1, 1], [], []>} : vector<2x32xf32>, vector<32x96xf32>, vector<2x96xf32> -> vector<2x96xf32>
    %441 = vector.broadcast %333 : vector<1x96xf32> to vector<2x96xf32>
    %442 = arith.addf %440, %441 : vector<2x96xf32>
    %443 = vector.extract_strided_slice %338 {offsets = [6, 0], sizes = [2, 96], strides = [1, 1]} : vector<16x96xf32> to vector<2x96xf32>
    %444 = vector.extract_strided_slice %443 {offsets = [0, 0], sizes = [2, 64], strides = [1, 1]} : vector<2x96xf32> to vector<2x64xf32>
    %445 = vector.extract_strided_slice %442 {offsets = [0, 0], sizes = [2, 64], strides = [1, 1]} : vector<2x96xf32> to vector<2x64xf32>
    %446 = arith.addf %444, %445 : vector<2x64xf32>
    %447 = arith.negf %446 : vector<2x64xf32>
    %448 = math.exp %447 : vector<2x64xf32>
    %cst_112 = arith.constant 1.000000e+00 : f32
    %449 = vector.broadcast %cst_112 : f32 to vector<2x64xf32>
    %450 = arith.addf %449, %448 : vector<2x64xf32>
    %451 = arith.divf %449, %450 : vector<2x64xf32>
    %452 = vector.extract_strided_slice %443 {offsets = [0, 64], sizes = [2, 32], strides = [1, 1]} : vector<2x96xf32> to vector<2x32xf32>
    %453 = vector.extract_strided_slice %451 {offsets = [0, 0], sizes = [2, 32], strides = [1, 1]} : vector<2x64xf32> to vector<2x32xf32>
    %454 = vector.extract_strided_slice %442 {offsets = [0, 64], sizes = [2, 32], strides = [1, 1]} : vector<2x96xf32> to vector<2x32xf32>
    %455 = arith.mulf %453, %454 : vector<2x32xf32>
    %456 = arith.addf %452, %455 : vector<2x32xf32>
    %457 = math.tanh %456 : vector<2x32xf32>
    %458 = vector.extract_strided_slice %451 {offsets = [0, 32], sizes = [2, 32], strides = [1, 1]} : vector<2x64xf32> to vector<2x32xf32>
    %cst_113 = arith.constant 1.000000e+00 : f32
    %459 = vector.broadcast %cst_113 : f32 to vector<2x32xf32>
    %460 = arith.subf %459, %458 : vector<2x32xf32>
    %461 = arith.mulf %460, %457 : vector<2x32xf32>
    %462 = vector.extract_strided_slice %451 {offsets = [0, 32], sizes = [2, 32], strides = [1, 1]} : vector<2x64xf32> to vector<2x32xf32>
    %463 = arith.mulf %462, %439 : vector<2x32xf32>
    %464 = arith.addf %461, %463 : vector<2x32xf32>
    %cst_114 = arith.constant dense<0.000000e+00> : vector<2x96xf32>
    %465 = tpu.matmul %464, %332, %cst_114 {dimension_numbers = #tpu.dot_dimension_numbers<[1], [0], [0], [1], [0, 0, 1, 1], [], []>} : vector<2x32xf32>, vector<32x96xf32>, vector<2x96xf32> -> vector<2x96xf32>
    %466 = vector.broadcast %333 : vector<1x96xf32> to vector<2x96xf32>
    %467 = arith.addf %465, %466 : vector<2x96xf32>
    %468 = vector.extract_strided_slice %338 {offsets = [4, 0], sizes = [2, 96], strides = [1, 1]} : vector<16x96xf32> to vector<2x96xf32>
    %469 = vector.extract_strided_slice %468 {offsets = [0, 0], sizes = [2, 64], strides = [1, 1]} : vector<2x96xf32> to vector<2x64xf32>
    %470 = vector.extract_strided_slice %467 {offsets = [0, 0], sizes = [2, 64], strides = [1, 1]} : vector<2x96xf32> to vector<2x64xf32>
    %471 = arith.addf %469, %470 : vector<2x64xf32>
    %472 = arith.negf %471 : vector<2x64xf32>
    %473 = math.exp %472 : vector<2x64xf32>
    %cst_115 = arith.constant 1.000000e+00 : f32
    %474 = vector.broadcast %cst_115 : f32 to vector<2x64xf32>
    %475 = arith.addf %474, %473 : vector<2x64xf32>
    %476 = arith.divf %474, %475 : vector<2x64xf32>
    %477 = vector.extract_strided_slice %468 {offsets = [0, 64], sizes = [2, 32], strides = [1, 1]} : vector<2x96xf32> to vector<2x32xf32>
    %478 = vector.extract_strided_slice %476 {offsets = [0, 0], sizes = [2, 32], strides = [1, 1]} : vector<2x64xf32> to vector<2x32xf32>
    %479 = vector.extract_strided_slice %467 {offsets = [0, 64], sizes = [2, 32], strides = [1, 1]} : vector<2x96xf32> to vector<2x32xf32>
    %480 = arith.mulf %478, %479 : vector<2x32xf32>
    %481 = arith.addf %477, %480 : vector<2x32xf32>
    %482 = math.tanh %481 : vector<2x32xf32>
    %483 = vector.extract_strided_slice %476 {offsets = [0, 32], sizes = [2, 32], strides = [1, 1]} : vector<2x64xf32> to vector<2x32xf32>
    %cst_116 = arith.constant 1.000000e+00 : f32
    %484 = vector.broadcast %cst_116 : f32 to vector<2x32xf32>
    %485 = arith.subf %484, %483 : vector<2x32xf32>
    %486 = arith.mulf %485, %482 : vector<2x32xf32>
    %487 = vector.extract_strided_slice %476 {offsets = [0, 32], sizes = [2, 32], strides = [1, 1]} : vector<2x64xf32> to vector<2x32xf32>
    %488 = arith.mulf %487, %464 : vector<2x32xf32>
    %489 = arith.addf %486, %488 : vector<2x32xf32>
    %cst_117 = arith.constant dense<0.000000e+00> : vector<2x96xf32>
    %490 = tpu.matmul %489, %332, %cst_117 {dimension_numbers = #tpu.dot_dimension_numbers<[1], [0], [0], [1], [0, 0, 1, 1], [], []>} : vector<2x32xf32>, vector<32x96xf32>, vector<2x96xf32> -> vector<2x96xf32>
    %491 = vector.broadcast %333 : vector<1x96xf32> to vector<2x96xf32>
    %492 = arith.addf %490, %491 : vector<2x96xf32>
    %493 = vector.extract_strided_slice %338 {offsets = [2, 0], sizes = [2, 96], strides = [1, 1]} : vector<16x96xf32> to vector<2x96xf32>
    %494 = vector.extract_strided_slice %493 {offsets = [0, 0], sizes = [2, 64], strides = [1, 1]} : vector<2x96xf32> to vector<2x64xf32>
    %495 = vector.extract_strided_slice %492 {offsets = [0, 0], sizes = [2, 64], strides = [1, 1]} : vector<2x96xf32> to vector<2x64xf32>
    %496 = arith.addf %494, %495 : vector<2x64xf32>
    %497 = arith.negf %496 : vector<2x64xf32>
    %498 = math.exp %497 : vector<2x64xf32>
    %cst_118 = arith.constant 1.000000e+00 : f32
    %499 = vector.broadcast %cst_118 : f32 to vector<2x64xf32>
    %500 = arith.addf %499, %498 : vector<2x64xf32>
    %501 = arith.divf %499, %500 : vector<2x64xf32>
    %502 = vector.extract_strided_slice %493 {offsets = [0, 64], sizes = [2, 32], strides = [1, 1]} : vector<2x96xf32> to vector<2x32xf32>
    %503 = vector.extract_strided_slice %501 {offsets = [0, 0], sizes = [2, 32], strides = [1, 1]} : vector<2x64xf32> to vector<2x32xf32>
    %504 = vector.extract_strided_slice %492 {offsets = [0, 64], sizes = [2, 32], strides = [1, 1]} : vector<2x96xf32> to vector<2x32xf32>
    %505 = arith.mulf %503, %504 : vector<2x32xf32>
    %506 = arith.addf %502, %505 : vector<2x32xf32>
    %507 = math.tanh %506 : vector<2x32xf32>
    %508 = vector.extract_strided_slice %501 {offsets = [0, 32], sizes = [2, 32], strides = [1, 1]} : vector<2x64xf32> to vector<2x32xf32>
    %cst_119 = arith.constant 1.000000e+00 : f32
    %509 = vector.broadcast %cst_119 : f32 to vector<2x32xf32>
    %510 = arith.subf %509, %508 : vector<2x32xf32>
    %511 = arith.mulf %510, %507 : vector<2x32xf32>
    %512 = vector.extract_strided_slice %501 {offsets = [0, 32], sizes = [2, 32], strides = [1, 1]} : vector<2x64xf32> to vector<2x32xf32>
    %513 = arith.mulf %512, %489 : vector<2x32xf32>
    %514 = arith.addf %511, %513 : vector<2x32xf32>
    %cst_120 = arith.constant dense<0.000000e+00> : vector<2x96xf32>
    %515 = tpu.matmul %514, %332, %cst_120 {dimension_numbers = #tpu.dot_dimension_numbers<[1], [0], [0], [1], [0, 0, 1, 1], [], []>} : vector<2x32xf32>, vector<32x96xf32>, vector<2x96xf32> -> vector<2x96xf32>
    %516 = vector.broadcast %333 : vector<1x96xf32> to vector<2x96xf32>
    %517 = arith.addf %515, %516 : vector<2x96xf32>
    %518 = vector.extract_strided_slice %338 {offsets = [0, 0], sizes = [2, 96], strides = [1, 1]} : vector<16x96xf32> to vector<2x96xf32>
    %519 = vector.extract_strided_slice %518 {offsets = [0, 0], sizes = [2, 64], strides = [1, 1]} : vector<2x96xf32> to vector<2x64xf32>
    %520 = vector.extract_strided_slice %517 {offsets = [0, 0], sizes = [2, 64], strides = [1, 1]} : vector<2x96xf32> to vector<2x64xf32>
    %521 = arith.addf %519, %520 : vector<2x64xf32>
    %522 = arith.negf %521 : vector<2x64xf32>
    %523 = math.exp %522 : vector<2x64xf32>
    %cst_121 = arith.constant 1.000000e+00 : f32
    %524 = vector.broadcast %cst_121 : f32 to vector<2x64xf32>
    %525 = arith.addf %524, %523 : vector<2x64xf32>
    %526 = arith.divf %524, %525 : vector<2x64xf32>
    %527 = vector.extract_strided_slice %518 {offsets = [0, 64], sizes = [2, 32], strides = [1, 1]} : vector<2x96xf32> to vector<2x32xf32>
    %528 = vector.extract_strided_slice %526 {offsets = [0, 0], sizes = [2, 32], strides = [1, 1]} : vector<2x64xf32> to vector<2x32xf32>
    %529 = vector.extract_strided_slice %517 {offsets = [0, 64], sizes = [2, 32], strides = [1, 1]} : vector<2x96xf32> to vector<2x32xf32>
    %530 = arith.mulf %528, %529 : vector<2x32xf32>
    %531 = arith.addf %527, %530 : vector<2x32xf32>
    %532 = math.tanh %531 : vector<2x32xf32>
    %533 = vector.extract_strided_slice %526 {offsets = [0, 32], sizes = [2, 32], strides = [1, 1]} : vector<2x64xf32> to vector<2x32xf32>
    %cst_122 = arith.constant 1.000000e+00 : f32
    %534 = vector.broadcast %cst_122 : f32 to vector<2x32xf32>
    %535 = arith.subf %534, %533 : vector<2x32xf32>
    %536 = arith.mulf %535, %532 : vector<2x32xf32>
    %537 = vector.extract_strided_slice %526 {offsets = [0, 32], sizes = [2, 32], strides = [1, 1]} : vector<2x64xf32> to vector<2x32xf32>
    %538 = arith.mulf %537, %514 : vector<2x32xf32>
    %539 = arith.addf %536, %538 : vector<2x32xf32>
    %c0_123 = arith.constant 0 : index
    %c0_124 = arith.constant 0 : index
    %540 = vector.load %arg10[%c0_123, %c0_124] : memref<32x4xf32, #tpu.memory_space<vmem>>, vector<32x4xf32>
    %cst_125 = arith.constant dense<0.000000e+00> : vector<2x4xf32>
    %541 = tpu.matmul %539, %540, %cst_125 {dimension_numbers = #tpu.dot_dimension_numbers<[1], [0], [0], [1], [0, 0, 1, 1], [], []>} : vector<2x32xf32>, vector<32x4xf32>, vector<2x4xf32> -> vector<2x4xf32>
    %c0_126 = arith.constant 0 : index
    %c0_127 = arith.constant 0 : index
    %542 = vector.load %arg11[%c0_126, %c0_127] : memref<1x4xf32, #tpu.memory_space<vmem>>, vector<1x4xf32>
    %543 = vector.broadcast %542 : vector<1x4xf32> to vector<2x4xf32>
    %544 = arith.addf %541, %543 : vector<2x4xf32>
    %c0_128 = arith.constant 0 : index
    %c0_129 = arith.constant 0 : index
    %545 = vector.load %arg12[%c0_128, %c0_129] : memref<2x4xf32, #tpu.memory_space<vmem>>, vector<2x4xf32>
    tpu.vector_store %arg12[%c0_128, %c0_129], %544 {strides = array<i32>} : memref<2x4xf32, #tpu.memory_space<vmem>>, vector<2x4xf32>,
    return
  }
}

</mosaic_0001>

<bundles_post_ra>
// kernel: textrnn_forward.1
= control target key start
LH: loop header
LB: loop body
LE: loop exit
PB: predicated region body
PF: predicated region fallthrough
CT: control target
= control target key end

     0   :  { %17 = vsyncpa [#allocation5], 0  ;;  %s3709_s0 = inlined_call_operand.hbm [shape: s32[2,8], index: 0, kind: input, shape index: {}]   ;;  %s3710_s1 = inlined_call_operand.vmem [shape: f32[50,1,16], index: 1, kind: input, shape index: {}]   ;;  %s3711_s2 = inlined_call_operand.vmem [shape: f32[16,192], index: 2, kind: input, shape index: {}]   ;;  %s3712_s3 = inlined_call_operand.hbm [shape: f32[1,192], index: 3, kind: input, shape index: {}]   ;;  %s3713_s4 = inlined_call_operand.hbm [shape: f32[64,192], index: 4, kind: input, shape index: {}]   ;;  %s3714_s5 = inlined_call_operand.hbm [shape: f32[1,192], index: 5, kind: input, shape index: {}]   ;;  %s3715_s6 = inlined_call_operand.vmem [shape: f32[64,96], index: 6, kind: input, shape index: {}]   ;;  %s3716_s7 = inlined_call_operand.vmem [shape: f32[1,96], index: 7, kind: input, shape index: {}]   ;;  %s3717_s8 = inlined_call_operand.vmem [shape: f32[32,96], index: 8, kind: input, shape index: {}]   ;;  %s3718_s9 = inlined_call_operand.vmem [shape: f32[1,96], index: 9, kind: input, shape index: {}]   ;;  %s3719_s10 = inlined_call_operand.vmem [shape: f32[32,4], index: 10, kind: input, shape index: {}]   ;;  %s3720_s11 = inlined_call_operand.hbm [shape: f32[1,4], index: 11, kind: input, shape index: {}]   ;;  %s3721_s12 = inlined_call_operand.hbm [shape: f32[2,4], index: 12, kind: output, shape index: {}]  }
   0x1   :  { %18 = vsyncpa [#allocation3], 0 }
   0x2   :  { %19 = vsyncpa [#allocation8], 0 }
   0x3   :  { %20 = vsyncpa [#allocation11], 0 }
   0x4   :  { %21 = vsyncpa [#allocation4], 0  ;;  %s3012_s21 = smov [#allocation7]   ;;  %s2882_s25 = scalar_lea.hbm %s3713_s4, 2048 }
   0x5   :  { %s49_s22 = sshll.u32 %s3012_s21, 4  ;;  %p2883_p0 = scmp.ne.s32.totalorder %s3713_s4, %s2882_s25  ;;  %s50_s22 = int_to_ptr.vmem [resolvable:$true] %s49_s22 }
   0x6   :  { %p2886_p1 = scmp.lt.u32.totalorder %s2882_s25, %s3713_s4 }
   0x8   :  { %p2888_p2 = pnand %p2886_p1, %p2883_p0 }
   0xa   :  { %2891 = shalt.err (!%p2888_p2)
}
   0xb   :  { %s2892_s30 = scalar_lea.vmem %s50_s22, 2048  ;;  %p2897_p4 = scmp.lt.s32.totalorder %s50_s22, %s50_s22 }
   0xc   :  { %p2893_p3 = scmp.ne.s32.totalorder %s50_s22, %s2892_s30  ;;  %p2898_p5 = scmp.lt.s32.totalorder %s2892_s30, %s2892_s30 }
   0xe   :  { %p2899_p6 = por %p2898_p5, %p2897_p4 }
  0x10   :  { %p2900_p7 = pnand %p2899_p6, %p2893_p3 }
  0x12   :  { %2903 = shalt.err (!%p2900_p7)
}
  0x13   :  { %s3013_s13 = smov 256   ;;  %s3014_s14 = smov 16  }
  0x14   :  { %55 = dma.hbm_to_vmem [thread:$0]  %s3713_s4, 2048, %s50_s22, [#allocation8], %s3013_s13, %s3013_s13, %s3014_s14  }
  0x15   :  { %s2904_s19 = scalar_lea.hbm %s3709_s0, 32 }
  0x16   :  { %p2905_p8 = scmp.ne.s32.totalorder %s3709_s0, %s2904_s19  ;;  %p2908_p9 = scmp.lt.u32.totalorder %s2904_s19, %s3709_s0 }
  0x18   :  { %p2910_p10 = pnand %p2908_p9, %p2905_p8 }
  0x1a   :  { %2913 = shalt.err (!%p2910_p10)
}
  0x1b   :  { %s3015_s25 = smov [#allocation2]   ;;  %s3016_s4 = smov [#allocation6]  }
  0x1c   :  { %29 = dma.hbm_to_smem %s3709_s0, 32, %s3015_s25, [#allocation5]  }
  0x1d   :  { %s40_s22 = sshll.u32 %s3016_s4, 4  ;;  %s3017_s28 = smov [#allocation9]   ;;  %s41_s22 = int_to_ptr.vmem [resolvable:$true] %s40_s22 }
  0x1e   :  { %s62_s29 = sshll.u32 %s3017_s28, 4  ;;  %s2914_s14 = scalar_lea.hbm %s3712_s3, 32  ;;  %s63_s29 = int_to_ptr.vmem [resolvable:$true] %s62_s29 }
  0x1f   :  { %p2915_p11 = scmp.ne.s32.totalorder %s3712_s3, %s2914_s14  ;;  %p2918_p12 = scmp.lt.u32.totalorder %s2914_s14, %s3712_s3 }
  0x21   :  { %p2920_p13 = pnand %p2918_p12, %p2915_p11 }
  0x23   :  { %2923 = shalt.err (!%p2920_p13)
}
  0x24   :  { %s2924_s0 = scalar_lea.vmem %s41_s22, 32  ;;  %p2929_p1 = scmp.lt.s32.totalorder %s41_s22, %s41_s22 }
  0x25   :  { %p2925_p0 = scmp.ne.s32.totalorder %s41_s22, %s2924_s0  ;;  %p2930_p2 = scmp.lt.s32.totalorder %s2924_s0, %s2924_s0 }
  0x27   :  { %p2931_p3 = por %p2930_p2, %p2929_p1 }
  0x29   :  { %p2932_p4 = pnand %p2931_p3, %p2925_p0 }
  0x2b   :  { %2935 = shalt.err (!%p2932_p4)
}
  0x2c   :  { %43 = dma.hbm_to_vmem [thread:$0]  %s3712_s3, 32, %s41_s22, [#allocation3]  }
  0x2d   :  { %s2936_s24 = scalar_lea.hbm %s3714_s5, 32 }
  0x2e   :  { %p2937_p5 = scmp.ne.s32.totalorder %s3714_s5, %s2936_s24  ;;  %p2940_p6 = scmp.lt.u32.totalorder %s2936_s24, %s3714_s5 }
  0x30   :  { %p2942_p7 = pnand %p2940_p6, %p2937_p5 }
  0x32   :  { %2945 = shalt.err (!%p2942_p7)
}
  0x33   :  { %s2946_s28 = scalar_lea.vmem %s63_s29, 32  ;;  %p2951_p9 = scmp.lt.s32.totalorder %s63_s29, %s63_s29 }
  0x34   :  { %p2947_p8 = scmp.ne.s32.totalorder %s63_s29, %s2946_s28  ;;  %p2952_p10 = scmp.lt.s32.totalorder %s2946_s28, %s2946_s28 }
  0x36   :  { %p2953_p11 = por %p2952_p10, %p2951_p9 }
  0x38   :  { %p2954_p12 = pnand %p2953_p11, %p2947_p8 }
  0x3a   :  { %2957 = shalt.err (!%p2954_p12)
}
  0x3b   :  { %65 = dma.hbm_to_vmem [thread:$0]  %s3714_s5, 32, %s63_s29, [#allocation8]  }
  0x3c   :  { %s3018_s30 = smov [#allocation10]   ;;  %s2958_s16 = scalar_lea.hbm %s3720_s11, 16 }
  0x3d   :  { %s82_s13 = sshll.u32 %s3018_s30, 4  ;;  %p2959_p13 = scmp.ne.s32.totalorder %s3720_s11, %s2958_s16  ;;  %s83_s13 = int_to_ptr.vmem [resolvable:$true] %s82_s13 }
  0x3e   :  { %p2962_p0 = scmp.lt.u32.totalorder %s2958_s16, %s3720_s11 }
  0x40   :  { %p2964_p1 = pnand %p2962_p0, %p2959_p13 }
  0x42   :  { %2967 = shalt.err (!%p2964_p1)
}
  0x43   :  { %s2968_s20 = scalar_lea.vmem %s83_s13, 16  ;;  %s2972_s5 = scalar_lea.vmem %s83_s13, 32 }
  0x44   :  { %p2969_p2 = scmp.ne.s32.totalorder %s83_s13, %s2968_s20  ;;  %p2973_p3 = scmp.lt.s32.totalorder %s83_s13, %s83_s13 }
  0x45   :  { %p2974_p4 = scmp.lt.s32.totalorder %s2972_s5, %s2968_s20 }
  0x47   :  { %p2975_p5 = por %p2974_p4, %p2973_p3 }
  0x49   :  { %p2976_p6 = pnand %p2975_p5, %p2969_p2 }
  0x4b   :  { %2979 = shalt.err (!%p2976_p6)
}
  0x4c   :  { %85 = dma.hbm_to_vmem [thread:$0]  %s3720_s11, 16, %s83_s13, [#allocation11]  }
  0x4d   :  { %3002 = dma.done.wait [#allocation5], 32  }
  0x4e   :  { %3003 = vsyncadd [#allocation5], 4294967264 }
  0x4f   :  { %3004 = dma.done.wait [#allocation3], 32  }
  0x50   :  { %3005 = vsyncadd [#allocation3], 4294967264 }
  0x51   :  { %3006 = dma.done.wait [#allocation8], 2080  }
  0x52   :  { %3007 = vsyncadd [#allocation8], 4294965216 }
  0x53   :  { %3008 = dma.done.wait [#allocation11], 16  }
  0x54   :  { %3009 = vsyncadd [#allocation11], 4294967280 }
  0x55   :  { %101 = sfence }
  0x56   :  { %v256_v0 = vld [vmem:[#allocation7 + $0x8] sm:$0xff]  ;;  %v258_v1 = vld [vmem:[#allocation7 + $0x18] sm:$0xff]  ;;  %v255_v2 = vld [vmem:[#allocation7] sm:$0xff]  ;;  %s3150_s23 = sld [smem:[#allocation2]]  ;;  %v3019_v7 = vmov 0.0   ;;  %s3169_s3 = sld [smem:[#allocation2 + $0x1]]  ;;  %v278_v61 = vlaneseq }
  0x57   :  { %v3152_v3 = vpack.c.bf16 %v258_v1, %v256_v0  ;;  %v257_v4 = vld [vmem:[#allocation7 + $0x10] sm:$0xff]  ;;  %v273_v5 = vld [vmem:[%s3711_s2 + $0x8] sm:$0xff]  ;;  %359 = vmatprep.mubr.f32.mxu0 %v3019_v7  ;;  %s3161_s27 = sld [smem:[#allocation2 + $0x80]]  ;;  %489 = vmatprep.mubr.f32.mxu1 %v3019_v7  ;;  %v262_v11 = vld [vmem:[#allocation7 + $0x38] sm:$0xff]  ;;  %s3177_s13 = sld [smem:[#allocation2 + $0x81]]  ;;  %vm234_vm0 = vcmask 1040384  }
  0x58   :  { %v275_v6 = vld [vmem:[%s3711_s2 + $0x18] sm:$0xff]  ;;  %v3164_v8 = vpack.c.bf16 %v257_v4, %v255_v2  ;;  %v260_v10 = vld [vmem:[#allocation7 + $0x28] sm:$0xff]  ;;  %v272_v12 = vld [vmem:[%s3711_s2] sm:$0xff]  ;;  %s3182_s14 = sld [smem:[#allocation2 + $0x2]]  ;;  %s3187_s16 = sld [smem:[#allocation2 + $0x3]]  ;;  %vm236_vm1 = vcmask 1041408  }
  0x59   :  { %v2571_v9 = vpack.c.bf16 %v275_v6, %v273_v5  ;;  %2576 = vmatprep.subr.bf16.mxu1 %v3152_v3  ;;  %v3172_v13 = vpack.c.bf16 %v262_v11, %v260_v10  ;;  %v274_v14 = vld [vmem:[%s3711_s2 + $0x10] sm:$0xff]  ;;  %v259_v15 = vld [vmem:[#allocation7 + $0x20] sm:$0xff]  ;;  %s3184_s15 = sld [smem:[#allocation2 + $0x82]]  ;;  %s3189_s2 = sld [smem:[#allocation2 + $0x83]]  ;;  %vm238_vm2 = vcmask 1042432   ;;  %v266_v20 = vld [vmem:[#allocation7 + $0x58] sm:$0xff] }
  0x5a   :  { %v261_v16 = vld [vmem:[#allocation7 + $0x30] sm:$0xff]  ;;  %2578 = vmatpush1.bf16.msra.mxu1 %v3164_v8  ;;  %v2573_v17 = vpack.c.bf16 %v274_v14, %v272_v12  ;;  %v264_v19 = vld [vmem:[#allocation7 + $0x48] sm:$0xff]  ;;  %v263_v21 = vld [vmem:[#allocation7 + $0x40] sm:$0xff]  ;;  %s3195_s19 = sld [smem:[#allocation2 + $0x4]]  ;;  %vm240_vm3 = vcmask 1043456   ;;  %s3213_s11 = sld [smem:[#allocation2 + $0x5]] }
  0x5b   :  { %2572 = vmatprep.subr.bf16.mxu0 %v2571_v9  ;;  %v3180_v18 = vpack.c.bf16 %v261_v16, %v259_v15  ;;  %2580 = vmatprep.subr.bf16.mxu1 %v3172_v13  ;;  %v3201_v23 = vpack.c.bf16 %v266_v20, %v264_v19  ;;  %v265_v24 = vld [vmem:[#allocation7 + $0x50] sm:$0xff]  ;;  %s3203_s21 = sld [smem:[#allocation2 + $0x84]]  ;;  %v268_v25 = vld [vmem:[#allocation7 + $0x68] sm:$0xff]  ;;  %v270_v28 = vld [vmem:[#allocation7 + $0x78] sm:$0xff]  ;;  %s3221_s28 = sld [smem:[#allocation2 + $0x85]]  ;;  %vm242_vm4 = vcmask 1044480  }
  0x5c   :  { %2574 = vmatpush1.bf16.msra.mxu0 %v2573_v17  ;;  %s103_s0 = scalar_lea.vmem %s3710_s1, %s3150_s23  ;;  %s109_s25 = scalar_lea.vmem %s3710_s1, %s3169_s3  ;;  %v3211_v27 = vpack.c.bf16 %v265_v24, %v263_v21  ;;  %v3223_v31 = vpack.c.bf16 %v270_v28, %v268_v25  ;;  %v267_v32 = vld [vmem:[#allocation7 + $0x60] sm:$0xff]  ;;  %v269_v33 = vld [vmem:[#allocation7 + $0x70] sm:$0xff]  ;;  %vm244_vm5 = vcmask 1045504   ;;  %vm246_vm6 = vcmask 1046528   ;;  %v276_v0 = vld [vmem:[#allocation6] sm:$0x3] }
  0x5d   :  { %v104_v22 = vld [vmem:[%s103_s0] sm:$0x1]  ;;  %s106_s29 = scalar_lea.vmem %s3710_s1, %s3161_s27  ;;  %2592 = vmatprep.subr.bf16.mxu0 %v3152_v3  ;;  %s112_s4 = scalar_lea.vmem %s3710_s1, %s3177_s13  ;;  %v3249_v42 = vpack.c.bf16 %v269_v33, %v267_v32  ;;  %vm288_vm7 = vcmask 130048   ;;  %v279_v62 = vshrl.u32 %v278_v61, 7  ;;  %v271_v9 = vld [vmem:[#allocation9] sm:$0x3] }
  0x5e   :  { %2582 = vmatpush1.bf16.msra.mxu1 %v3180_v18  ;;  %v2346_v26 = vld [vmem:[%s106_s29] ss:$0 sm:$0xff]  ;;  %s115_s30 = scalar_lea.vmem %s3710_s1, %s3182_s14  ;;  %s121_s5 = scalar_lea.vmem %s3710_s1, %s3187_s16  ;;  %vm378_vm8 = vcmask 261120   ;;  %vm380_vm9 = vcmask 523264   ;;  %vm382_vm10 = vcmask 785408   ;;  %vm3022_vm11 = vmmov 0  }
  0x5f   :  { %v2347_v29 = vld [vmem:[%s109_s25] ss:$0 sm:$0xff]  ;;  %v235_v30 = vsel %vm234_vm0, %v104_v22, %v2346_v26  ;;  %2584 = vmatprep.subr.bf16.mxu1 %v3201_v23  ;;  %s118_s13 = scalar_lea.vmem %s3710_s1, %s3184_s15  ;;  %s124_s24 = scalar_lea.vmem %s3710_s1, %s3189_s2  ;;  %v280_v63 = vsub.s32 0, %v279_v62  ;;  %v284_v1 = vsub.s32 1, %v279_v62  ;;  %vm2295_vm12 = vcmask 25600  }
  0x60   :  { %v2348_v34 = vld [vmem:[%s112_s4] ss:$0 sm:$0xff]  ;;  %v237_v35 = vsel %vm236_vm1, %v235_v30, %v2347_v29  ;;  %s127_s16 = scalar_lea.vmem %s3710_s1, %s3195_s19  ;;  %s2342_s25 = sld [smem:[#allocation2 + $0x6]] }
  0x61   :  { %v2349_v36 = vld [vmem:[%s115_s30] ss:$0 sm:$0xff]  ;;  %v239_v38 = vsel %vm238_vm2, %v237_v35, %v2348_v34  ;;  %s130_s27 = scalar_lea.vmem %s3710_s1, %s3203_s21  ;;  %s2343_s4 = sld [smem:[#allocation2 + $0x86]]  ;;  %v281_v4 = vrot.slane %v276_v0, %v280_v63  ;;  %v285_v6 = vrot.slane %v276_v0, %v284_v1  ;;  %v3310_v14 = vrot.slane %v271_v9, %v280_v63 }
  0x62   :  { %v2350_v37 = vld [vmem:[%s118_s13] ss:$0 sm:$0xff]  ;;  %v241_v41 = vsel %vm240_vm3, %v239_v38, %v2349_v36  ;;  %2586 = vmatpush1.bf16.msra.mxu1 %v3211_v27  ;;  %s133_s19 = scalar_lea.vmem %s3710_s1, %s3213_s11  ;;  %s2344_s30 = sld [smem:[#allocation2 + $0x7]] }
  0x63   :  { %v2351_v39 = vld [vmem:[%s121_s5] ss:$0 sm:$0xff]  ;;  %v243_v43 = vsel %vm242_vm4, %v241_v41, %v2350_v37  ;;  %2588 = vmatprep.subr.bf16.mxu1 %v3223_v31  ;;  %s136_s13 = scalar_lea.vmem %s3710_s1, %s3221_s28  ;;  %s2345_s0 = sld [smem:[#allocation2 + $0x87]] }
  0x64   :  { %v2352_v40 = vld [vmem:[%s124_s24] ss:$0 sm:$0xff]  ;;  %v245_v45 = vsel %vm244_vm5, %v243_v43, %v2351_v39 }
  0x65   :  { %v128_v44 = vld [vmem:[%s127_s16] sm:$0x1]  ;;  %v247_v47 = vsel %vm246_vm6, %v245_v45, %v2352_v40 }
  0x66   :  { %v2353_v46 = vld [vmem:[%s130_s27] ss:$0 sm:$0xff]  ;;  %2360 = vmatmul.mubr.msk.f32.vlgmr.msra.gmra.mrb[0].mxu0 %vm288_vm7, %v247_v47  ;;  %2590 = vmatpush1.bf16.msra.mxu1 %v3249_v42  ;;  %s139_s28 = scalar_lea.vmem %s3710_s1, %s2342_s25 }
  0x67   :  { %v2354_v48 = vld [vmem:[%s133_s19] ss:$0 sm:$0xff]  ;;  %v248_v49 = vsel %vm234_vm0, %v128_v44, %v2353_v46  ;;  %365 = vmatprep.mubr.f32.mxu0 %v3019_v7  ;;  %2594 = vmatpush1.bf16.msra.mxu0 %v3164_v8  ;;  %s142_s29 = scalar_lea.vmem %s3710_s1, %s2343_s4 }
  0x68   :  { %v2355_v50 = vld [vmem:[%s136_s13] ss:$0 sm:$0xff]  ;;  %v249_v51 = vsel %vm236_vm1, %v248_v49, %v2354_v48  ;;  %2596 = vmatprep.subr.bf16.mxu0 %v3172_v13  ;;  %2608 = vmatprep.subr.bf16.mxu1 %v3152_v3  ;;  %s145_s14 = scalar_lea.vmem %s3710_s1, %s2344_s30 }
  0x69   :  { %v250_v52 = vsel %vm238_vm2, %v249_v51, %v2355_v50  ;;  %v2356_v53 = vld [vmem:[%s139_s28] ss:$0 sm:$0xff]  ;;  %490 = vmatmul.mubr.f32.vlgmr.msra.gmra.mrb[0].mxu1 %v3019_v7  ;;  %s148_s25 = scalar_lea.vmem %s3710_s1, %s2345_s0  ;;  %s3020_s1 = smov 64  }
  0x6a   :  { %v2357_v54 = vld [vmem:[%s142_s29] ss:$0 sm:$0xff]  ;;  %v251_v55 = vsel %vm240_vm3, %v250_v52, %v2356_v53  ;;  %2610 = vmatpush1.bf16.msra.mxu1 %v3164_v8  ;;  %686 = vmatprep.mubr.f32.mxu1 %v3019_v7 }
  0x6b   :  { %v2358_v56 = vld [vmem:[%s145_s14] ss:$0 sm:$0xff]  ;;  %v252_v57 = vsel %vm242_vm4, %v251_v55, %v2357_v54  ;;  %2598 = vmatpush1.bf16.msra.mxu0 %v3180_v18  ;;  %2612 = vmatprep.subr.bf16.mxu1 %v3172_v13  ;;  %v3346_v54 = vrot.slane %v271_v9, %v284_v1 }
  0x6c   :  { %v2359_v58 = vld [vmem:[%s148_s25] ss:$0 sm:$0xff]  ;;  %v253_v59 = vsel %vm244_vm5, %v252_v57, %v2358_v56  ;;  %2600 = vmatprep.subr.bf16.mxu0 %v3201_v23 }
  0x6d   :  { %v254_v60 = vsel %vm246_vm6, %v253_v59, %v2359_v58 }
  0x6e   :  { %2361 = vmatmul.mubr.msk.f32.gmra.mrb[2].mxu0 %vm288_vm7, %v254_v60  ;;  %2614 = vmatpush1.bf16.msra.mxu1 %v3180_v18 }
  0x6f   :  { %2602 = vmatpush1.bf16.msra.mxu0 %v3211_v27  ;;  %583 = vmatprep.mubr.f32.mxu0 %v3019_v7 }
  0x70   :  { %2604 = vmatprep.subr.bf16.mxu0 %v3223_v31  ;;  %2616 = vmatprep.subr.bf16.mxu1 %v3201_v23 }
  0x72   :  { %2618 = vmatpush1.bf16.msra.mxu1 %v3211_v27 }
  0x73   :  { %2606 = vmatpush1.bf16.msra.mxu0 %v3249_v42  ;;  %2620 = vmatprep.subr.bf16.mxu1 %v3223_v31 }
  0x74   :  { %2624 = vmatprep.subr.bf16.mxu0 %v3152_v3 }
  0x76   :  { %2622 = vmatpush1.bf16.msra.mxu1 %v3249_v42 }
  0x77   :  { %2640 = vmatprep.subr.bf16.mxu1 %v3152_v3 }
 0x139   :  { %v361_v2 = vpop.f32.mrb[0].mxu0 }
 0x13a   :  { %v363_v5 = vpop.f32.mrb[1].mxu0  ;;  %v362_v12 = vadd.f32 %v361_v2, %v281_v4 }
 0x13b   :  { %v364_v15 = vadd.f32 %v363_v5, %v285_v6 }
 0x13c   :  { %v491_v10 = vpop.f32.mrb[0].mxu1  ;;  %v394_v20 = vrot.slane %v362_v12, 6  ;;  %v403_v21 = vrot.slane %v362_v12, 2 }
 0x13d   :  { %v493_v11 = vpop.f32.mrb[1].mxu1  ;;  %v397_v22 = vrot.slane %v364_v15, 6  ;;  %v405_v24 = vrot.slane %v364_v15, 2  ;;  %v492_v26 = vadd.f32 %v491_v10, %v3310_v14 }
 0x13e   :  { %v494_v55 = vadd.f32 %v493_v11, %v3346_v54 }
 0x141   :  { %v367_v16 = vpop.f32.mrb[2].mxu0 }
 0x142   :  { %v368_v17 = vadd.f32 %v367_v16, %v281_v4  ;;  %v369_v19 = vpop.f32.mrb[3].mxu0 }
 0x143   :  { %v370_v25 = vadd.f32 %v369_v19, %v285_v6 }
 0x144   :  { %v373_v28 = vrot.slane %v368_v17, 6  ;;  %v385_v29 = vrot.slane %v368_v17, 2  ;;  %v399_v30 = vsel %vm378_vm8, %v368_v17, %v394_v20  ;;  %v407_v32 = vsel %vm378_vm8, %v368_v17, %v403_v21 }
 0x145   :  { %v376_v33 = vrot.slane %v370_v25, 6  ;;  %v387_v34 = vrot.slane %v370_v25, 2  ;;  %v400_v35 = vsel %vm380_vm9, %v399_v30, %v368_v17  ;;  %v3317_v36 = vsel %vm378_vm8, %v370_v25, %v397_v22 }
 0x146   :  { %v379_v37 = vsel %vm378_vm8, %v362_v12, %v373_v28  ;;  %v389_v38 = vsel %vm378_vm8, %v362_v12, %v385_v29  ;;  %v3322_v39 = vsel %vm382_vm10, %v400_v35, %v394_v20  ;;  %v408_v40 = vsel %vm380_vm9, %v407_v32, %v368_v17 }
 0x147   :  { %v381_v41 = vsel %vm380_vm9, %v379_v37, %v362_v12  ;;  %v3327_v43 = vsel %vm378_vm8, %v364_v15, %v376_v33  ;;  %v390_v44 = vsel %vm380_vm9, %v389_v38, %v362_v12  ;;  %v3331_v45 = vsel %vm378_vm8, %v364_v15, %v387_v34 }
 0x148   :  { %v3334_v46 = vsel %vm382_vm10, %v381_v41, %v373_v28  ;;  %v3337_v47 = vsel %vm382_vm10, %v390_v44, %v385_v29  ;;  %v3340_v48 = vsel %vm382_vm10, %v408_v40, %v403_v21  ;;  %v3343_v49 = vsel %vm378_vm8, %v370_v25, %v405_v24 }
 0x149   :  { %v496_v50 = vadd.f32 %v492_v26, %v3334_v46 }
 0x14b   :  { %v2362_v51 = vmul.f32 -1.442695, %v496_v50 }
 0x14d   :  { %2786 = vpow2.f32 %v2362_v51 }
 0x157   :  { %v2787_v52 = vpop.eup %2786 }
 0x158   :  { %v500_v53 = vadd.f32 1.0, %v2787_v52 }
 0x15a   :  { %2788 = vrcp.f32 %v500_v53 }
 0x164   :  { %v2789_v56 = vpop.eup %2788 }
 0x165   :  { %v503_v57 = vmul.f32 %v2789_v56, %v494_v55  ;;  %v506_v60 = vsub.f32 1.0, %v2789_v56  ;;  %v512_v62 = vmul.f32 0.0, %v2789_v56 }
 0x167   :  { %v504_v58 = vadd.f32 %v503_v57, %v3327_v43 }
 0x169   :  { %2790 = vtanh.f32 %v504_v58 }
 0x173   :  { %v2791_v59 = vpop.eup %2790 }
 0x174   :  { %508 = vrot.lane.b32.xlu0 %v2791_v59, %s3020_s1 }
 0x1e6   :  { %v509_v61 = vpop.permute.xlu0 %508 }
 0x1e7   :  { %v511_v63 = vmul.f32 %v509_v61, %v506_v60 }
 0x1e9   :  { %v3351_v0 = vadd.f32 %v512_v62, %v511_v63 }
 0x1eb   :  { %515 = vrot.lane.b32.xlu0 %v3351_v0, %s3020_s1  ;;  %v612_v24 = vrot.slane %v3351_v0, 6 }
 0x25d   :  { %v516_v1 = vpop.permute.xlu0 %515 }
 0x25e   :  { %2363 = vmatmul.mubr.msk.f32.vlgmr.msra.gmra.mrb[4].mxu0 %vm380_vm9, %v516_v1 }
 0x25f   :  { %2626 = vmatpush1.bf16.msra.mxu0 %v3164_v8  ;;  %789 = vmatprep.mubr.f32.mxu0 %v3019_v7 }
 0x260   :  { %2628 = vmatprep.subr.bf16.mxu0 %v3172_v13 }
 0x263   :  { %2630 = vmatpush1.bf16.msra.mxu0 %v3180_v18 }
 0x264   :  { %2632 = vmatprep.subr.bf16.mxu0 %v3201_v23 }
 0x267   :  { %2634 = vmatpush1.bf16.msra.mxu0 %v3211_v27 }
 0x268   :  { %2636 = vmatprep.subr.bf16.mxu0 %v3223_v31 }
 0x26b   :  { %2638 = vmatpush1.bf16.msra.mxu0 %v3249_v42 }
 0x26c   :  { %2656 = vmatprep.subr.bf16.mxu0 %v3152_v3 }
 0x331   :  { %v585_v2 = vpop.f32.mrb[4].mxu0 }
 0x332   :  { %v586_v4 = vadd.f32 %v585_v2, %v3310_v14  ;;  %v587_v5 = vpop.f32.mrb[5].mxu0 }
 0x333   :  { %v588_v15 = vadd.f32 %v587_v5, %v3346_v54 }
 0x334   :  { %v591_v6 = vrot.slane %v586_v4, 6 }
 0x335   :  { %v601_v16 = vrot.slane %v588_v15, 6 }
 0x336   :  { %v593_v9 = vadd.f32 %v591_v6, %v3337_v47 }
 0x338   :  { %v2364_v10 = vmul.f32 -1.442695, %v593_v9 }
 0x33a   :  { %2792 = vpow2.f32 %v2364_v10 }
 0x344   :  { %v2793_v11 = vpop.eup %2792 }
 0x345   :  { %v597_v12 = vadd.f32 1.0, %v2793_v11 }
 0x347   :  { %2794 = vrcp.f32 %v597_v12 }
 0x351   :  { %v2795_v17 = vpop.eup %2794 }
 0x352   :  { %v603_v19 = vmul.f32 %v2795_v17, %v601_v16  ;;  %v606_v22 = vsub.f32 1.0, %v2795_v17  ;;  %v614_v28 = vmul.f32 %v2795_v17, %v612_v24 }
 0x354   :  { %v604_v20 = vadd.f32 %v603_v19, %v3331_v45 }
 0x356   :  { %2796 = vtanh.f32 %v604_v20 }
 0x360   :  { %v2797_v21 = vpop.eup %2796 }
 0x361   :  { %608 = vrot.lane.b32.xlu1 %v2797_v21, %s3020_s1 }
 0x3d3   :  { %v609_v25 = vpop.permute.xlu1 %608 }
 0x3d4   :  { %v611_v26 = vmul.f32 %v609_v25, %v606_v22 }
 0x3d6   :  { %v3371_v29 = vadd.f32 %v614_v28, %v611_v26 }
 0x3d8   :  { %v617_v30 = vrot.slane %v3371_v29, 2  ;;  %v715_v58 = vrot.slane %v3371_v29, 6  ;;  %v1226_v62 = vsel %vm236_vm1, %v3351_v0, %v3371_v29 }
 0x3da   :  { %618 = vrot.lane.b32.xlu1 %v617_v30, %s3020_s1 }
 0x44c   :  { %v619_v32 = vpop.permute.xlu1 %618 }
 0x44d   :  { %2365 = vmatmul.mubr.msk.f32.vlgmr.msra.gmra.mrb[2].mxu1 %vm380_vm9, %v619_v32 }
 0x44e   :  { %2642 = vmatpush1.bf16.msra.mxu1 %v3164_v8  ;;  %892 = vmatprep.mubr.f32.mxu1 %v3019_v7 }
 0x44f   :  { %2644 = vmatprep.subr.bf16.mxu1 %v3172_v13 }
 0x452   :  { %2646 = vmatpush1.bf16.msra.mxu1 %v3180_v18 }
 0x453   :  { %2648 = vmatprep.subr.bf16.mxu1 %v3201_v23 }
 0x456   :  { %2650 = vmatpush1.bf16.msra.mxu1 %v3211_v27 }
 0x457   :  { %2652 = vmatprep.subr.bf16.mxu1 %v3223_v31 }
 0x45a   :  { %2654 = vmatpush1.bf16.msra.mxu1 %v3249_v42 }
 0x45b   :  { %2672 = vmatprep.subr.bf16.mxu1 %v3152_v3 }
 0x520   :  { %v688_v33 = vpop.f32.mrb[2].mxu1 }
 0x521   :  { %v689_v34 = vadd.f32 %v688_v33, %v3310_v14  ;;  %v690_v35 = vpop.f32.mrb[3].mxu1 }
 0x522   :  { %v691_v50 = vadd.f32 %v690_v35, %v3346_v54 }
 0x523   :  { %v694_v37 = vrot.slane %v689_v34, 4 }
 0x524   :  { %v704_v51 = vrot.slane %v691_v50, 4 }
 0x525   :  { %v696_v38 = vadd.f32 %v694_v37, %v3334_v46 }
 0x527   :  { %v2366_v40 = vmul.f32 -1.442695, %v696_v38 }
 0x529   :  { %2798 = vpow2.f32 %v2366_v40 }
 0x533   :  { %v2799_v41 = vpop.eup %2798 }
 0x534   :  { %v700_v44 = vadd.f32 1.0, %v2799_v41 }
 0x536   :  { %2800 = vrcp.f32 %v700_v44 }
 0x540   :  { %v2801_v52 = vpop.eup %2800 }
 0x541   :  { %v706_v53 = vmul.f32 %v2801_v52, %v704_v51  ;;  %v709_v57 = vsub.f32 1.0, %v2801_v52  ;;  %v717_v59 = vmul.f32 %v2801_v52, %v715_v58 }
 0x543   :  { %v707_v55 = vadd.f32 %v706_v53, %v3327_v43 }
 0x545   :  { %2802 = vtanh.f32 %v707_v55 }
 0x54f   :  { %v2803_v56 = vpop.eup %2802 }
 0x550   :  { %711 = vrot.lane.b32.xlu0 %v2803_v56, %s3020_s1 }
 0x5c2   :  { %v712_v46 = vpop.permute.xlu0 %711 }
 0x5c3   :  { %v714_v60 = vmul.f32 %v712_v46, %v709_v57 }
 0x5c5   :  { %v3393_v61 = vadd.f32 %v717_v59, %v714_v60 }
 0x5c7   :  { %v720_v43 = vrot.slane %v3393_v61, 4  ;;  %v1227_v63 = vsel %vm240_vm3, %v1226_v62, %v3393_v61  ;;  %v818_v17 = vrot.slane %v3393_v61, 6 }
 0x5c9   :  { %721 = vrot.lane.b32.xlu1 %v720_v43, %s3020_s1 }
 0x63b   :  { %v722_v1 = vpop.permute.xlu1 %721 }
 0x63c   :  { %2367 = vmatmul.mubr.msk.f32.vlgmr.msra.gmra.mrb[6].mxu0 %vm380_vm9, %v722_v1 }
 0x63d   :  { %2658 = vmatpush1.bf16.msra.mxu0 %v3164_v8  ;;  %987 = vmatprep.mubr.f32.mxu0 %v3019_v7 }
 0x63e   :  { %2660 = vmatprep.subr.bf16.mxu0 %v3172_v13 }
 0x641   :  { %2662 = vmatpush1.bf16.msra.mxu0 %v3180_v18 }
 0x642   :  { %2664 = vmatprep.subr.bf16.mxu0 %v3201_v23 }
 0x645   :  { %2666 = vmatpush1.bf16.msra.mxu0 %v3211_v27 }
 0x646   :  { %2668 = vmatprep.subr.bf16.mxu0 %v3223_v31 }
 0x649   :  { %2670 = vmatpush1.bf16.msra.mxu0 %v3249_v42 }
 0x64a   :  { %2688 = vmatprep.subr.bf16.mxu0 %v3152_v3 }
 0x70f   :  { %v791_v2 = vpop.f32.mrb[6].mxu0 }
 0x710   :  { %v792_v4 = vadd.f32 %v791_v2, %v3310_v14  ;;  %v793_v5 = vpop.f32.mrb[7].mxu0 }
 0x711   :  { %v794_v15 = vadd.f32 %v793_v5, %v3346_v54 }
 0x712   :  { %v797_v6 = vrot.slane %v792_v4, 2 }
 0x713   :  { %v807_v16 = vrot.slane %v794_v15, 2 }
 0x714   :  { %v799_v9 = vadd.f32 %v797_v6, %v3337_v47 }
 0x716   :  { %v2368_v10 = vmul.f32 -1.442695, %v799_v9 }
 0x718   :  { %2804 = vpow2.f32 %v2368_v10 }
 0x722   :  { %v2805_v11 = vpop.eup %2804 }
 0x723   :  { %v803_v12 = vadd.f32 1.0, %v2805_v11 }
 0x725   :  { %2806 = vrcp.f32 %v803_v12 }
 0x72f   :  { %v2807_v19 = vpop.eup %2806 }
 0x730   :  { %v809_v20 = vmul.f32 %v2807_v19, %v807_v16  ;;  %v820_v3 = vmul.f32 %v2807_v19, %v818_v17  ;;  %v812_v47 = vsub.f32 1.0, %v2807_v19 }
 0x732   :  { %v810_v21 = vadd.f32 %v809_v20, %v3331_v45 }
 0x734   :  { %2808 = vtanh.f32 %v810_v21 }
 0x73e   :  { %v2809_v22 = vpop.eup %2808 }
 0x73f   :  { %814 = vrot.lane.b32.xlu0 %v2809_v22, %s3020_s1 }
 0x7b1   :  { %v815_v24 = vpop.permute.xlu0 %814 }
 0x7b2   :  { %v817_v25 = vmul.f32 %v815_v24, %v812_v47 }
 0x7b4   :  { %v821_v26 = vadd.f32 %v820_v3, %v817_v25 }
 0x7b6   :  { %v3418_v28 = vrot.slane %v821_v26, 6  ;;  %v3421_v30 = vsel %vm244_vm5, %v1227_v63, %v821_v26 }
 0x7b8   :  { %824 = vrot.lane.b32.xlu1 %v3418_v28, %s3020_s1 }
 0x82a   :  { %v825_v32 = vpop.permute.xlu1 %824 }
 0x82b   :  { %2369 = vmatmul.mubr.msk.f32.vlgmr.msra.gmra.mrb[4].mxu1 %vm380_vm9, %v825_v32 }
 0x82c   :  { %2674 = vmatpush1.bf16.msra.mxu1 %v3164_v8  ;;  %1090 = vmatprep.mubr.f32.mxu1 %v3019_v7 }
 0x82d   :  { %2676 = vmatprep.subr.bf16.mxu1 %v3172_v13 }
 0x830   :  { %2678 = vmatpush1.bf16.msra.mxu1 %v3180_v18 }
 0x831   :  { %2680 = vmatprep.subr.bf16.mxu1 %v3201_v23 }
 0x834   :  { %2682 = vmatpush1.bf16.msra.mxu1 %v3211_v27 }
 0x835   :  { %2684 = vmatprep.subr.bf16.mxu1 %v3223_v31 }
 0x838   :  { %2686 = vmatpush1.bf16.msra.mxu1 %v3249_v42 }
 0x8fe   :  { %v894_v45 = vpop.f32.mrb[4].mxu1 }
 0x8ff   :  { %v895_v33 = vadd.f32 %v894_v45, %v3310_v14  ;;  %v896_v34 = vpop.f32.mrb[5].mxu1 }
 0x900   :  { %v897_v41 = vadd.f32 %v896_v34, %v3346_v54 }
 0x901   :  { %v899_v35 = vadd.f32 %v895_v33, %v3322_v39 }
 0x903   :  { %v2370_v37 = vmul.f32 -1.442695, %v899_v35 }
 0x905   :  { %2810 = vpow2.f32 %v2370_v37 }
 0x90f   :  { %v2811_v38 = vpop.eup %2810 }
 0x910   :  { %v903_v40 = vadd.f32 1.0, %v2811_v38 }
 0x912   :  { %2812 = vrcp.f32 %v903_v40 }
 0x91c   :  { %v2813_v44 = vpop.eup %2812 }
 0x91d   :  { %v906_v50 = vmul.f32 %v2813_v44, %v897_v41  ;;  %v909_v53 = vsub.f32 1.0, %v2813_v44  ;;  %v916_v56 = vmul.f32 %v2813_v44, %v3418_v28 }
 0x91f   :  { %v907_v51 = vadd.f32 %v906_v50, %v3317_v36 }
 0x921   :  { %2814 = vtanh.f32 %v907_v51 }
 0x92b   :  { %v2815_v52 = vpop.eup %2814 }
 0x92c   :  { %911 = vrot.lane.b32.xlu0 %v2815_v52, %s3020_s1 }
 0x99e   :  { %v912_v55 = vpop.permute.xlu0 %911 }
 0x99f   :  { %v914_v57 = vmul.f32 %v912_v55, %v909_v53 }
 0x9a1   :  { %v3440_v46 = vadd.f32 %v916_v56, %v914_v57 }
 0x9a3   :  { %919 = vrot.lane.b32.xlu1 %v3440_v46, %s3020_s1  ;;  %v1016_v6 = vrot.slane %v3440_v46, 6 }
 0xa15   :  { %v920_v59 = vpop.permute.xlu1 %919 }
 0xa16   :  { %2371 = vmatmul.mubr.msk.f32.vlgmr.msra.gmra.mrb[8].mxu0 %vm380_vm9, %v920_v59 }
 0xa17   :  { %2690 = vmatpush1.bf16.msra.mxu0 %v3164_v8  ;;  %1193 = vmatprep.mubr.f32.mxu0 %v3019_v7 }
 0xa18   :  { %2692 = vmatprep.subr.bf16.mxu0 %v3172_v13 }
 0xa1b   :  { %2694 = vmatpush1.bf16.msra.mxu0 %v3180_v18 }
 0xa1c   :  { %2696 = vmatprep.subr.bf16.mxu0 %v3201_v23 }
 0xa1f   :  { %2698 = vmatpush1.bf16.msra.mxu0 %v3211_v27 }
 0xa20   :  { %2700 = vmatprep.subr.bf16.mxu0 %v3223_v31 }
 0xa23   :  { %2702 = vmatpush1.bf16.msra.mxu0 %v3249_v42 }
 0xae9   :  { %v989_v60 = vpop.f32.mrb[8].mxu0 }
 0xaea   :  { %v990_v62 = vadd.f32 %v989_v60, %v3310_v14  ;;  %v991_v43 = vpop.f32.mrb[9].mxu0 }
 0xaeb   :  { %v992_v18 = vadd.f32 %v991_v43, %v3346_v54 }
 0xaec   :  { %v995_v63 = vrot.slane %v990_v62, 6 }
 0xaed   :  { %v1005_v23 = vrot.slane %v992_v18, 6  ;;  %v1269_v18 = vld [vmem:[%s3717_s8 + $0x10] sm:$0xff] }
 0xaee   :  { %v997_v8 = vadd.f32 %v995_v63, %v3340_v48 }
 0xaf0   :  { %v2372_v1 = vmul.f32 -1.442695, %v997_v8 }
 0xaf2   :  { %2816 = vpow2.f32 %v2372_v1 }
 0xafc   :  { %v2817_v13 = vpop.eup %2816 }
 0xafd   :  { %v1001_v2 = vadd.f32 1.0, %v2817_v13 }
 0xaff   :  { %2818 = vrcp.f32 %v1001_v2 }
 0xb09   :  { %v2819_v27 = vpop.eup %2818 }
 0xb0a   :  { %v1007_v4 = vmul.f32 %v2819_v27, %v1005_v23  ;;  %v1010_v5 = vsub.f32 1.0, %v2819_v27  ;;  %v1018_v11 = vmul.f32 %v2819_v27, %v1016_v6  ;;  %v3021_v23 = vmov 0.0|0.0   ;;  %v1270_v27 = vld [vmem:[%s3717_s8 + $0x18] sm:$0xff] }
 0xb0b   :  { %2719 = vmatprep.subr.bf16.mxu0 %v3021_v23  ;;  %v1275_v6 = vld [vmem:[%s3715_s6 + $0x18] sm:$0xff] }
 0xb0c   :  { %v1008_v31 = vadd.f32 %v1007_v4, %v3343_v49  ;;  %v1272_v4 = vld [vmem:[%s3715_s6] sm:$0xff] }
 0xb0e   :  { %2820 = vtanh.f32 %v1008_v31  ;;  %v1273_v31 = vld [vmem:[%s3715_s6 + $0x8] sm:$0xff] }
 0xb18   :  { %v2821_v42 = vpop.eup %2820 }
 0xb19   :  { %1012 = vrot.lane.b32.xlu0 %v2821_v42, %s3020_s1  ;;  %v2703_v42 = vpack.c.bf16 %v1273_v31, %v1272_v4 }
 0xb1b   :  { %2704 = vmatprep.subr.bf16.mxu1 %v2703_v42 }
 0xb8b   :  { %v1013_v9 = vpop.permute.xlu0 %1012 }
 0xb8c   :  { %v1015_v10 = vmul.f32 %v1013_v9, %v1010_v5  ;;  %v1274_v5 = vld [vmem:[%s3715_s6 + $0x10] sm:$0xff]  ;;  %v3522_v9 = vpack.c.bf16 %v1270_v27, %v1269_v18 }
 0xb8e   :  { %v3459_v12 = vadd.f32 %v1018_v11, %v1015_v10  ;;  %v2707_v10 = vpack.c.bf16 %v1275_v6, %v1274_v5  ;;  %v1276_v11 = vld [vmem:[%s3715_s6 + $0x20] sm:$0xff] }
 0xb90   :  { %v1021_v15 = vrot.slane %v3459_v12, 2  ;;  %v1119_v37 = vrot.slane %v3459_v12, 6  ;;  %v1229_v44 = vsel %vm236_vm1, %v3440_v46, %v3459_v12 }
 0xb92   :  { %1022 = vrot.lane.b32.xlu1 %v1021_v15, %s3020_s1  ;;  %v1277_v15 = vld [vmem:[%s3715_s6 + $0x28] sm:$0xff] }
 0xc04   :  { %v1023_v16 = vpop.permute.xlu1 %1022 }
 0xc05   :  { %2373 = vmatmul.mubr.msk.f32.vlgmr.msra.gmra.mrb[6].mxu1 %vm380_vm9, %v1023_v16  ;;  %v2711_v16 = vpack.c.bf16 %v1277_v15, %v1276_v11 }
 0xc06   :  { %2706 = vmatpush3.bf16.msra.mxu1 %v2703_v42 }
 0xc07   :  { %2708 = vmatprep.subr.bf16.mxu1 %v2707_v10 }
 0xc0a   :  { %2710 = vmatpush3.bf16.msra.mxu1 %v2707_v10 }
 0xc0b   :  { %2712 = vmatprep.subr.bf16.mxu1 %v2711_v16 }
 0xc0e   :  { %2714 = vmatpush3.bf16.msra.mxu1 %v2711_v16 }
 0xcd8   :  { %v1092_v17 = vpop.f32.mrb[6].mxu1 }
 0xcd9   :  { %v1093_v19 = vadd.f32 %v1092_v17, %v3310_v14  ;;  %v1094_v20 = vpop.f32.mrb[7].mxu1  ;;  %v1278_v17 = vld [vmem:[%s3715_s6 + $0x30] sm:$0xff] }
 0xcda   :  { %v1095_v25 = vadd.f32 %v1094_v20, %v3346_v54 }
 0xcdb   :  { %v1098_v3 = vrot.slane %v1093_v19, 4  ;;  %v1279_v19 = vld [vmem:[%s3715_s6 + $0x38] sm:$0xff] }
 0xcdc   :  { %v1108_v26 = vrot.slane %v1095_v25, 4  ;;  %v2715_v20 = vpack.c.bf16 %v1279_v19, %v1278_v17 }
 0xcdd   :  { %v1100_v21 = vadd.f32 %v1098_v3, %v3322_v39 }
 0xcde   :  { %2716 = vmatprep.subr.bf16.mxu1 %v2715_v20 }
 0xcdf   :  { %v2374_v22 = vmul.f32 -1.442695, %v1100_v21  ;;  %2718 = vmatpush3.bf16.msra.mxu1 %v2715_v20 }
 0xce0   :  { %2731 = vmatprep.subr.bf16.mxu1 %v3021_v23 }
 0xce1   :  { %2822 = vpow2.f32 %v2374_v22 }
 0xceb   :  { %v2823_v47 = vpop.eup %2822 }
 0xcec   :  { %v1104_v24 = vadd.f32 1.0, %v2823_v47 }
 0xcee   :  { %2824 = vrcp.f32 %v1104_v24  ;;  %v1239_v24 = vrot.slane %v3393_v61, 2 }
 0xcf8   :  { %v2825_v32 = vpop.eup %2824 }
 0xcf9   :  { %v1110_v45 = vmul.f32 %v2825_v32, %v1108_v26  ;;  %v1113_v35 = vsub.f32 1.0, %v2825_v32  ;;  %v1121_v38 = vmul.f32 %v2825_v32, %v1119_v37 }
 0xcfb   :  { %v1111_v33 = vadd.f32 %v1110_v45, %v3317_v36  ;;  %v1237_v45 = vrot.slane %v3440_v46, 2 }
 0xcfd   :  { %2826 = vtanh.f32 %v1111_v33 }
 0xd07   :  { %v2827_v34 = vpop.eup %2826 }
 0xd08   :  { %1115 = vrot.lane.b32.xlu0 %v2827_v34, %s3020_s1  ;;  %v1246_v34 = vsel %vm236_vm1, %v3418_v28, %v1239_v24  ;;  %v3570_v28 = vld [vmem:[%s3718_s9] ss:$0 sm:$0xff] }
 0xd7a   :  { %v1116_v39 = vpop.permute.xlu0 %1115 }
 0xd7b   :  { %v1118_v40 = vmul.f32 %v1116_v39, %v1113_v35  ;;  %v1247_v39 = vsel %vm240_vm3, %v1246_v34, %v715_v58 }
 0xd7d   :  { %v3472_v41 = vadd.f32 %v1121_v38, %v1118_v40  ;;  %v1241_v38 = vrot.slane %v3351_v0, 2 }
 0xd7f   :  { %v1124_v36 = vrot.slane %v3472_v41, 4  ;;  %v3480_v50 = vsel %vm240_vm3, %v1229_v44, %v3472_v41  ;;  %v1235_v25 = vrot.slane %v3472_v41, 2  ;;  %v1248_v46 = vsel %vm244_vm5, %v1247_v39, %v1241_v38 }
 0xd81   :  { %1125 = vrot.lane.b32.xlu1 %v1124_v36, %s3020_s1 }
 0xd85   :  { %1251 = vrot.lane.b32.xlu1 %v3421_v30, %s3020_s1  ;;  %v1222_v30 = vrot.slane %v3472_v41, 6 }
 0xdf3   :  { %v1126_v51 = vpop.permute.xlu1 %1125 }
 0xdf4   :  { %2375 = vmatmul.mubr.msk.f32.vlgmr.msra.gmra.mrb[10].mxu0 %vm380_vm9, %v1126_v51  ;;  %v2377_v51 = vld [vmem:[%s3716_s7] ss:$0 sm:$0xff]  ;;  %s3023_s7 = smov 96  }
 0xdf5   :  { %2480 = vmatprep.mubr.msk.f32.mxu0 %vm3022_vm11, %v3019_v7 }
 0xdf7   :  { %v1252_v29 = vpop.permute.xlu1 %1251 }
 0xec7   :  { %v1195_v52 = vpop.f32.mrb[10].mxu0 }
 0xec8   :  { %v1196_v53 = vadd.f32 %v1195_v52, %v3310_v14  ;;  %v1197_v55 = vpop.f32.mrb[11].mxu0 }
 0xec9   :  { %v1198_v43 = vadd.f32 %v1197_v55, %v3346_v54  ;;  %v1268_v54 = vld [vmem:[%s3717_s8 + $0x8] sm:$0xff] }
 0xeca   :  { %v1201_v56 = vrot.slane %v1196_v53, 2 }
 0xecb   :  { %v1211_v63 = vrot.slane %v1198_v43, 2 }
 0xecc   :  { %v1203_v57 = vadd.f32 %v1201_v56, %v3340_v48  ;;  %v1267_v48 = vld [vmem:[%s3717_s8] sm:$0xff] }
 0xece   :  { %v2376_v59 = vmul.f32 -1.442695, %v1203_v57 }
 0xed0   :  { %2828 = vpow2.f32 %v2376_v59 }
 0xeda   :  { %v2829_v60 = vpop.eup %2828 }
 0xedb   :  { %v1207_v62 = vadd.f32 1.0, %v2829_v60 }
 0xedd   :  { %2830 = vrcp.f32 %v1207_v62 }
 0xee7   :  { %v2831_v8 = vpop.eup %2830 }
 0xee8   :  { %v1213_v1 = vmul.f32 %v2831_v8, %v1211_v63  ;;  %v1224_v13 = vmul.f32 %v2831_v8, %v1222_v30  ;;  %v1216_v3 = vsub.f32 1.0, %v2831_v8 }
 0xeea   :  { %v1214_v2 = vadd.f32 %v1213_v1, %v3343_v49  ;;  %v3502_v49 = vpack.c.bf16 %v1268_v54, %v1267_v48 }
 0xeec   :  { %2832 = vtanh.f32 %v1214_v2  ;;  %2721 = vmatpush3.bf16.msra.mxu0 %v3502_v49 }
 0xeed   :  { %2722 = vmatprep.subr.bf16.mxu0 %v3021_v23 }
 0xef0   :  { %2724 = vmatpush3.bf16.msra.mxu0 %v3522_v9 }
 0xef1   :  { %2725 = vmatprep.subr.bf16.mxu0 %v3021_v23 }
 0xef3   :  { %2481 = vmatmul.mubr.f32.vlgmr.msra.gmra.mrb[12].mxu0 %v3019_v7 }
 0xef4   :  { %2727 = vmatpush3.bf16.msra.mxu0 %v3502_v49  ;;  %2491 = vmatprep.mubr.msk.f32.mxu0 %vm3022_vm11, %v3019_v7 }
 0xef5   :  { %2728 = vmatprep.subr.bf16.mxu0 %v3021_v23 }
 0xef6   :  { %v2833_v14 = vpop.eup %2832 }
 0xef7   :  { %1218 = vrot.lane.b32.xlu0 %v2833_v14, %s3020_s1 }
 0xef8   :  { %2730 = vmatpush3.bf16.msra.mxu0 %v3522_v9 }
 0xef9   :  { %2737 = vmatprep.subr.bf16.mxu0 %v3021_v23 }
 0xf69   :  { %v1219_v21 = vpop.permute.xlu0 %1218 }
 0xf6a   :  { %v1221_v22 = vmul.f32 %v1219_v21, %v1216_v3 }
 0xf6c   :  { %v1225_v47 = vadd.f32 %v1224_v13, %v1221_v22 }
 0xf6e   :  { %v1233_v26 = vrot.slane %v1225_v47, 6  ;;  %v1231_v32 = vsel %vm244_vm5, %v3480_v50, %v1225_v47 }
 0xf6f   :  { %1253 = vrot.lane.b32.xlu1 %v1231_v32, %s3020_s1 }
 0xf70   :  { %v1243_v33 = vsel %vm236_vm1, %v1233_v26, %v1235_v25 }
 0xf71   :  { %v1244_v35 = vsel %vm240_vm3, %v1243_v33, %v1119_v37 }
 0xf72   :  { %v1245_v61 = vsel %vm244_vm5, %v1244_v35, %v1237_v45 }
 0xf73   :  { %1259 = vrot.lane.b32.xlu0 %v1245_v61, %s3020_s1 }
 0xf77   :  { %1261 = vrot.lane.b32.xlu0 %v1248_v46, %s3020_s1 }
 0xfc6   :  { %v1442_v12 = vpop.f32.mrb[12].mxu0 }
 0xfc7   :  { %v1443_v37 = vadd.f32 %v3570_v28, %v1442_v12  ;;  %v2482_v40 = vpop.f32.mrb[13].mxu0 }
 0xfc9   :  { %v1447_v41 = vrot.slane %v1443_v37, 2 }
 0xfcb   :  { %1456 = vrot.lane.b32.xlu1 %v1447_v41, %s3020_s1 }
 0xfe1   :  { %v1254_v44 = vpop.permute.xlu1 %1253 }
 0xfe5   :  { %v1260_v58 = vpop.permute.xlu0 %1259 }
 0xfe6   :  { %v1265_v0 = vsel %vm378_vm8, %v1252_v29, %v1260_v58 }
 0xfe7   :  { %2469 = vmatprep.mubr.msk.f32.mxu1 %vm380_vm9, %v1265_v0 }
 0xfe9   :  { %v1262_v36 = vpop.permute.xlu0 %1261 }
 0xfea   :  { %v1266_v50 = vsel %vm378_vm8, %v1254_v44, %v1262_v36 }
 0xfeb   :  { %2470 = vmatmul.mubr.msk.f32.vlgmr.msra.gmra.mrb[8].mxu1 %vm380_vm9, %v1266_v50 }
 0xfec   :  { %2733 = vmatpush3.bf16.msra.mxu1 %v3502_v49  ;;  %2502 = vmatprep.mubr.msk.f32.mxu1 %vm3022_vm11, %v3019_v7 }
 0xfed   :  { %2734 = vmatprep.subr.bf16.mxu1 %v3021_v23 }
 0xff0   :  { %2736 = vmatpush3.bf16.msra.mxu1 %v3522_v9 }
 0xff1   :  { %2743 = vmatprep.subr.bf16.mxu1 %v3021_v23 }
0x103d   :  { %v1457_v43 = vpop.permute.xlu1 %1456 }
0x10be   :  { %v2471_v52 = vpop.f32.mrb[8].mxu1 }
0x10bf   :  { %v3587_v53 = vadd.f32 %v2471_v52, %v2377_v51  ;;  %v1359_v55 = vpop.f32.mrb[9].mxu1 }
0x10c0   :  { %v3589_v56 = vadd.f32 %v2377_v51, %v1359_v55 }
0x10c1   :  { %v1449_v57 = vadd.f32 %v1447_v41, %v3587_v53 }
0x10c3   :  { %v2381_v59 = vmul.f32 -1.442695, %v1449_v57 }
0x10c5   :  { %2834 = vpow2.f32 %v2381_v59 }
0x10cf   :  { %v2835_v60 = vpop.eup %2834 }
0x10d0   :  { %v1453_v62 = vadd.f32 1.0, %v2835_v60 }
0x10d2   :  { %2836 = vrcp.f32 %v1453_v62 }
0x10dc   :  { %v2837_v63 = vpop.eup %2836 }
0x10dd   :  { %v1459_v30 = vmul.f32 %v2837_v63, %v1457_v43  ;;  %v1466_v2 = vsub.f32 1.0, %v2837_v63  ;;  %v1472_v48 = vmul.f32 0.0, %v2837_v63 }
0x10df   :  { %1461 = vrot.lane.b32.xlu0 %v1459_v30, %s3020_s1 }
0x1151   :  { %v1462_v8 = vpop.permute.xlu0 %1461 }
0x1152   :  { %v1464_v1 = vadd.f32 %v1462_v8, %v3587_v53 }
0x1154   :  { %2838 = vtanh.f32 %v1464_v1 }
0x115e   :  { %v2839_v13 = vpop.eup %2838 }
0x115f   :  { %1468 = vrot.lane.b32.xlu1 %v2839_v13, %s3023_s7 }
0x11d1   :  { %v1469_v14 = vpop.permute.xlu1 %1468 }
0x11d2   :  { %v1471_v54 = vmul.f32 %v1469_v14, %v1466_v2 }
0x11d4   :  { %v1473_v18 = vadd.f32 %v1472_v48, %v1471_v54 }
0x11d6   :  { %v1475_v27 = vrot.slane %v1473_v18, 6  ;;  %v1576_v47 = vrot.slane %v1473_v18, 2 }
0x11d8   :  { %1476 = vrot.lane.b32.xlu0 %v1475_v27, %s3023_s7 }
0x124a   :  { %v1477_v4 = vpop.permute.xlu0 %1476 }
0x124b   :  { %2492 = vmatmul.mubr.msk.f32.vlgmr.msra.gmra.mrb[14].mxu0 %vm378_vm8, %v1477_v4 }
0x124c   :  { %2739 = vmatpush3.bf16.msra.mxu0 %v3502_v49  ;;  %2513 = vmatprep.mubr.msk.f32.mxu0 %vm3022_vm11, %v3019_v7 }
0x124d   :  { %2740 = vmatprep.subr.bf16.mxu0 %v3021_v23 }
0x1250   :  { %2742 = vmatpush3.bf16.msra.mxu0 %v3522_v9 }
0x1251   :  { %2749 = vmatprep.subr.bf16.mxu0 %v3021_v23 }
0x131e   :  { %v1546_v31 = vpop.f32.mrb[14].mxu0 }
0x131f   :  { %v1547_v42 = vadd.f32 %v3570_v28, %v1546_v31  ;;  %v2493_v5 = vpop.f32.mrb[15].mxu0 }
0x1321   :  { %v1551_v6 = vrot.slane %v1547_v42, 4 }
0x1323   :  { %1560 = vrot.lane.b32.xlu1 %v1551_v6, %s3020_s1  ;;  %v1553_v10 = vadd.f32 %v1551_v6, %v3587_v53 }
0x1325   :  { %v2383_v11 = vmul.f32 -1.442695, %v1553_v10 }
0x1327   :  { %2840 = vpow2.f32 %v2383_v11 }
0x1331   :  { %v2841_v15 = vpop.eup %2840 }
0x1332   :  { %v1557_v16 = vadd.f32 1.0, %v2841_v15 }
0x1334   :  { %2842 = vrcp.f32 %v1557_v16 }
0x133e   :  { %v2843_v17 = vpop.eup %2842 }
0x133f   :  { %v1570_v24 = vsub.f32 1.0, %v2843_v17  ;;  %v1578_v26 = vmul.f32 %v2843_v17, %v1576_v47 }
0x1395   :  { %v1561_v19 = vpop.permute.xlu1 %1560 }
0x1396   :  { %v1563_v20 = vmul.f32 %v2843_v17, %v1561_v19 }
0x1398   :  { %1565 = vrot.lane.b32.xlu0 %v1563_v20, %s3020_s1 }
0x140a   :  { %v1566_v3 = vpop.permute.xlu0 %1565 }
0x140b   :  { %v1568_v21 = vadd.f32 %v1566_v3, %v3587_v53 }
0x140d   :  { %2844 = vtanh.f32 %v1568_v21 }
0x1417   :  { %v2845_v22 = vpop.eup %2844 }
0x1418   :  { %1572 = vrot.lane.b32.xlu1 %v2845_v22, %s3023_s7 }
0x148a   :  { %v1573_v25 = vpop.permute.xlu1 %1572 }
0x148b   :  { %v1575_v32 = vmul.f32 %v1573_v25, %v1570_v24 }
0x148d   :  { %v1579_v45 = vadd.f32 %v1578_v26, %v1575_v32 }
0x148f   :  { %v1581_v33 = vrot.slane %v1579_v45, 4  ;;  %v1682_v50 = vrot.slane %v1579_v45, 2 }
0x1491   :  { %1582 = vrot.lane.b32.xlu0 %v1581_v33, %s3023_s7 }
0x1503   :  { %v1583_v34 = vpop.permute.xlu0 %1582 }
0x1504   :  { %2503 = vmatmul.mubr.msk.f32.vlgmr.msra.gmra.mrb[10].mxu1 %vm378_vm8, %v1583_v34 }
0x1505   :  { %2745 = vmatpush3.bf16.msra.mxu1 %v3502_v49  ;;  %2524 = vmatprep.mubr.msk.f32.mxu1 %vm3022_vm11, %v3019_v7 }
0x1506   :  { %2746 = vmatprep.subr.bf16.mxu1 %v3021_v23 }
0x1509   :  { %2748 = vmatpush3.bf16.msra.mxu1 %v3522_v9 }
0x150a   :  { %2755 = vmatprep.subr.bf16.mxu1 %v3021_v23 }
0x15d7   :  { %v1652_v35 = vpop.f32.mrb[10].mxu1 }
0x15d8   :  { %v1653_v61 = vadd.f32 %v3570_v28, %v1652_v35  ;;  %v2504_v39 = vpop.f32.mrb[11].mxu1 }
0x15da   :  { %v1657_v38 = vrot.slane %v1653_v61, 6 }
0x15dc   :  { %1666 = vrot.lane.b32.xlu1 %v1657_v38, %s3020_s1  ;;  %v1659_v46 = vadd.f32 %v1657_v38, %v3587_v53 }
0x15de   :  { %v2385_v12 = vmul.f32 -1.442695, %v1659_v46 }
0x15e0   :  { %2846 = vpow2.f32 %v2385_v12 }
0x15ea   :  { %v2847_v37 = vpop.eup %2846 }
0x15eb   :  { %v1663_v40 = vadd.f32 1.0, %v2847_v37 }
0x15ed   :  { %2848 = vrcp.f32 %v1663_v40 }
0x15f7   :  { %v2849_v41 = vpop.eup %2848 }
0x15f8   :  { %v1676_v51 = vsub.f32 1.0, %v2849_v41  ;;  %v1684_v55 = vmul.f32 %v2849_v41, %v1682_v50 }
0x164e   :  { %v1667_v29 = vpop.permute.xlu1 %1666 }
0x164f   :  { %v1669_v58 = vmul.f32 %v2849_v41, %v1667_v29 }
0x1651   :  { %1671 = vrot.lane.b32.xlu0 %v1669_v58, %s3020_s1 }
0x16c3   :  { %v1672_v0 = vpop.permute.xlu0 %1671 }
0x16c4   :  { %v1674_v44 = vadd.f32 %v1672_v0, %v3587_v53 }
0x16c6   :  { %2850 = vtanh.f32 %v1674_v44 }
0x16d0   :  { %v2851_v36 = vpop.eup %2850 }
0x16d1   :  { %1678 = vrot.lane.b32.xlu1 %v2851_v36, %s3023_s7 }
0x1743   :  { %v1679_v52 = vpop.permute.xlu1 %1678 }
0x1744   :  { %v1681_v57 = vmul.f32 %v1679_v52, %v1676_v51 }
0x1746   :  { %v1685_v59 = vadd.f32 %v1684_v55, %v1681_v57 }
0x1748   :  { %v1687_v60 = vrot.slane %v1685_v59, 2 }
0x174a   :  { %1688 = vrot.lane.b32.xlu0 %v1687_v60, %s3023_s7 }
0x17bc   :  { %v1689_v62 = vpop.permute.xlu0 %1688 }
0x17bd   :  { %2514 = vmatmul.mubr.msk.f32.vlgmr.msra.gmra.mrb[16].mxu0 %vm378_vm8, %v1689_v62 }
0x17be   :  { %2751 = vmatpush3.bf16.msra.mxu0 %v3502_v49  ;;  %2535 = vmatprep.mubr.msk.f32.mxu0 %vm3022_vm11, %v3019_v7 }
0x17bf   :  { %2752 = vmatprep.subr.bf16.mxu0 %v3021_v23 }
0x17c2   :  { %2754 = vmatpush3.bf16.msra.mxu0 %v3522_v9 }
0x17c3   :  { %2761 = vmatprep.subr.bf16.mxu0 %v3021_v23 }
0x1890   :  { %v1758_v43 = vpop.f32.mrb[16].mxu0 }
0x1891   :  { %v1759_v63 = vadd.f32 %v3570_v28, %v1758_v43  ;;  %v2515_v30 = vpop.f32.mrb[17].mxu0 }
0x1893   :  { %1770 = vrot.lane.b32.xlu1 %v1759_v63, %s3020_s1  ;;  %v1762_v8 = vadd.f32 %v1759_v63, %v3587_v53 }
0x1895   :  { %v2387_v1 = vmul.f32 -1.442695, %v1762_v8 }
0x1897   :  { %2852 = vpow2.f32 %v2387_v1 }
0x18a1   :  { %v2853_v13 = vpop.eup %2852 }
0x18a2   :  { %v1766_v2 = vadd.f32 1.0, %v2853_v13 }
0x18a4   :  { %2854 = vrcp.f32 %v1766_v2 }
0x18ae   :  { %v2855_v14 = vpop.eup %2854 }
0x18af   :  { %v1780_v31 = vsub.f32 1.0, %v2855_v14  ;;  %v1787_v5 = vmul.f32 %v2855_v14, %v1687_v60 }
0x1905   :  { %v1771_v48 = vpop.permute.xlu1 %1770 }
0x1906   :  { %v1773_v54 = vmul.f32 %v2855_v14, %v1771_v48 }
0x1908   :  { %1775 = vrot.lane.b32.xlu0 %v1773_v54, %s3020_s1 }
0x197a   :  { %v1776_v18 = vpop.permute.xlu0 %1775 }
0x197b   :  { %v1778_v27 = vadd.f32 %v1776_v18, %v3587_v53 }
0x197d   :  { %2856 = vtanh.f32 %v1778_v27 }
0x1987   :  { %v2857_v4 = vpop.eup %2856 }
0x1988   :  { %1782 = vrot.lane.b32.xlu1 %v2857_v4, %s3023_s7 }
0x19fa   :  { %v1783_v42 = vpop.permute.xlu1 %1782 }
0x19fb   :  { %v1785_v6 = vmul.f32 %v1783_v42, %v1780_v31 }
0x19fd   :  { %v1788_v10 = vadd.f32 %v1787_v5, %v1785_v6 }
0x19ff   :  { %1790 = vrot.lane.b32.xlu0 %v1788_v10, %s3023_s7  ;;  %v1890_v45 = vrot.slane %v1788_v10, 2 }
0x1a71   :  { %v1791_v11 = vpop.permute.xlu0 %1790 }
0x1a72   :  { %2525 = vmatmul.mubr.msk.f32.vlgmr.msra.gmra.mrb[12].mxu1 %vm378_vm8, %v1791_v11 }
0x1a73   :  { %2757 = vmatpush3.bf16.msra.mxu1 %v3502_v49  ;;  %2546 = vmatprep.mubr.msk.f32.mxu1 %vm3022_vm11, %v3019_v7 }
0x1a74   :  { %2758 = vmatprep.subr.bf16.mxu1 %v3021_v23 }
0x1a77   :  { %2760 = vmatpush3.bf16.msra.mxu1 %v3522_v9 }
0x1a78   :  { %2767 = vmatprep.subr.bf16.mxu1 %v3021_v23 }
0x1b45   :  { %v1860_v53 = vpop.f32.mrb[12].mxu1 }
0x1b46   :  { %v1861_v15 = vadd.f32 %v3570_v28, %v1860_v53  ;;  %v2526_v16 = vpop.f32.mrb[13].mxu1 }
0x1b48   :  { %v1865_v17 = vrot.slane %v1861_v15, 2 }
0x1b4a   :  { %1874 = vrot.lane.b32.xlu1 %v1865_v17, %s3020_s1  ;;  %v1867_v19 = vadd.f32 %v1865_v17, %v3589_v56 }
0x1b4c   :  { %v2389_v20 = vmul.f32 -1.442695, %v1867_v19 }
0x1b4e   :  { %2858 = vpow2.f32 %v2389_v20 }
0x1b58   :  { %v2859_v3 = vpop.eup %2858 }
0x1b59   :  { %v1871_v21 = vadd.f32 1.0, %v2859_v3 }
0x1b5b   :  { %2860 = vrcp.f32 %v1871_v21 }
0x1b65   :  { %v2861_v22 = vpop.eup %2860 }
0x1b66   :  { %v1884_v33 = vsub.f32 1.0, %v2861_v22  ;;  %v1892_v35 = vmul.f32 %v2861_v22, %v1890_v45 }
0x1bbc   :  { %v1875_v47 = vpop.permute.xlu1 %1874 }
0x1bbd   :  { %v1877_v24 = vmul.f32 %v2861_v22, %v1875_v47 }
0x1bbf   :  { %1879 = vrot.lane.b32.xlu0 %v1877_v24, %s3020_s1 }
0x1c31   :  { %v1880_v25 = vpop.permute.xlu0 %1879 }
0x1c32   :  { %v1882_v26 = vadd.f32 %v1880_v25, %v3589_v56 }
0x1c34   :  { %2862 = vtanh.f32 %v1882_v26 }
0x1c3e   :  { %v2863_v32 = vpop.eup %2862 }
0x1c3f   :  { %1886 = vrot.lane.b32.xlu1 %v2863_v32, %s3023_s7 }
0x1cb1   :  { %v1887_v34 = vpop.permute.xlu1 %1886 }
0x1cb2   :  { %v1889_v61 = vmul.f32 %v1887_v34, %v1884_v33 }
0x1cb4   :  { %v1893_v39 = vadd.f32 %v1892_v35, %v1889_v61  ;;  %v2210_v35 = vld [vmem:[%s3719_s10 + $0x8] sm:$0xff]  ;;  %v2211_v61 = vld [vmem:[%s3719_s10 + $0x10] sm:$0xff] }
0x1cb6   :  { %v1895_v38 = vrot.slane %v1893_v39, 6  ;;  %v1996_v55 = vrot.slane %v1893_v39, 2 }
0x1cb8   :  { %1896 = vrot.lane.b32.xlu0 %v1895_v38, %s3023_s7  ;;  %v2212_v38 = vld [vmem:[%s3719_s10 + $0x18] sm:$0xff] }
0x1d2a   :  { %v1897_v46 = vpop.permute.xlu0 %1896 }
0x1d2b   :  { %2536 = vmatmul.mubr.msk.f32.vlgmr.msra.gmra.mrb[18].mxu0 %vm378_vm8, %v1897_v46 }
0x1d2c   :  { %2763 = vmatpush3.bf16.msra.mxu0 %v3502_v49  ;;  %2557 = vmatprep.mubr.msk.f32.mxu0 %vm3022_vm11, %v3019_v7 }
0x1d2d   :  { %2764 = vmatprep.subr.bf16.mxu0 %v3021_v23 }
0x1d30   :  { %2766 = vmatpush3.bf16.msra.mxu0 %v3522_v9 }
0x1dfe   :  { %v1966_v12 = vpop.f32.mrb[18].mxu0 }
0x1dff   :  { %v1967_v37 = vadd.f32 %v3570_v28, %v1966_v12  ;;  %v2537_v40 = vpop.f32.mrb[19].mxu0 }
0x1e01   :  { %v1971_v41 = vrot.slane %v1967_v37, 4 }
0x1e03   :  { %1980 = vrot.lane.b32.xlu1 %v1971_v41, %s3020_s1  ;;  %v1973_v29 = vadd.f32 %v1971_v41, %v3589_v56 }
0x1e05   :  { %v2391_v58 = vmul.f32 -1.442695, %v1973_v29 }
0x1e07   :  { %2864 = vpow2.f32 %v2391_v58 }
0x1e11   :  { %v2865_v0 = vpop.eup %2864 }
0x1e12   :  { %v1977_v49 = vadd.f32 1.0, %v2865_v0  ;;  %v2396_v0 = vld [vmem:[#allocation10] ss:$0 sm:$0xff] }
0x1e14   :  { %2866 = vrcp.f32 %v1977_v49 }
0x1e1e   :  { %v2867_v44 = vpop.eup %2866 }
0x1e1f   :  { %v1990_v57 = vsub.f32 1.0, %v2867_v44  ;;  %v1998_v60 = vmul.f32 %v2867_v44, %v1996_v55 }
0x1e75   :  { %v1981_v36 = vpop.permute.xlu1 %1980 }
0x1e76   :  { %v1983_v50 = vmul.f32 %v2867_v44, %v1981_v36 }
0x1e78   :  { %1985 = vrot.lane.b32.xlu0 %v1983_v50, %s3020_s1 }
0x1eea   :  { %v1986_v9 = vpop.permute.xlu0 %1985 }
0x1eeb   :  { %v1988_v51 = vadd.f32 %v1986_v9, %v3589_v56 }
0x1eed   :  { %2868 = vtanh.f32 %v1988_v51 }
0x1ef7   :  { %v2869_v52 = vpop.eup %2868 }
0x1ef8   :  { %1992 = vrot.lane.b32.xlu1 %v2869_v52, %s3023_s7 }
0x1f6a   :  { %v1993_v59 = vpop.permute.xlu1 %1992 }
0x1f6b   :  { %v1995_v62 = vmul.f32 %v1993_v59, %v1990_v57 }
0x1f6d   :  { %v1999_v43 = vadd.f32 %v1998_v60, %v1995_v62 }
0x1f6f   :  { %v2001_v63 = vrot.slane %v1999_v43, 4  ;;  %v2102_v6 = vrot.slane %v1999_v43, 2 }
0x1f71   :  { %2002 = vrot.lane.b32.xlu0 %v2001_v63, %s3023_s7 }
0x1fe3   :  { %v2003_v30 = vpop.permute.xlu0 %2002 }
0x1fe4   :  { %2547 = vmatmul.mubr.msk.f32.vlgmr.msra.gmra.mrb[14].mxu1 %vm378_vm8, %v2003_v30 }
0x1fe5   :  { %2568 = vmatprep.mubr.msk.f32.mxu1 %vm3022_vm11, %v3019_v7 }
0x20b7   :  { %v2072_v8 = vpop.f32.mrb[14].mxu1 }
0x20b8   :  { %v2073_v1 = vadd.f32 %v3570_v28, %v2072_v8  ;;  %v2548_v13 = vpop.f32.mrb[15].mxu1 }
0x20ba   :  { %v2077_v2 = vrot.slane %v2073_v1, 6 }
0x20bc   :  { %2086 = vrot.lane.b32.xlu1 %v2077_v2, %s3020_s1  ;;  %v2079_v14 = vadd.f32 %v2077_v2, %v3589_v56 }
0x20be   :  { %v2393_v48 = vmul.f32 -1.442695, %v2079_v14 }
0x20c0   :  { %2870 = vpow2.f32 %v2393_v48 }
0x20ca   :  { %v2871_v54 = vpop.eup %2870 }
0x20cb   :  { %v2083_v18 = vadd.f32 1.0, %v2871_v54 }
0x20cd   :  { %2872 = vrcp.f32 %v2083_v18 }
0x20d7   :  { %v2873_v27 = vpop.eup %2872 }
0x20d8   :  { %v2096_v10 = vsub.f32 1.0, %v2873_v27  ;;  %v2104_v53 = vmul.f32 %v2873_v27, %v2102_v6 }
0x212e   :  { %v2087_v4 = vpop.permute.xlu1 %2086 }
0x212f   :  { %v2089_v31 = vmul.f32 %v2873_v27, %v2087_v4 }
0x2131   :  { %2091 = vrot.lane.b32.xlu0 %v2089_v31, %s3020_s1 }
0x21a3   :  { %v2092_v7 = vpop.permute.xlu0 %2091 }
0x21a4   :  { %v2094_v42 = vadd.f32 %v2092_v7, %v3589_v56 }
0x21a6   :  { %2874 = vtanh.f32 %v2094_v42 }
0x21b0   :  { %v2875_v5 = vpop.eup %2874 }
0x21b1   :  { %2098 = vrot.lane.b32.xlu1 %v2875_v5, %s3023_s7 }
0x2223   :  { %v2099_v11 = vpop.permute.xlu1 %2098 }
0x2224   :  { %v2101_v15 = vmul.f32 %v2099_v11, %v2096_v10 }
0x2226   :  { %v2105_v16 = vadd.f32 %v2104_v53, %v2101_v15 }
0x2228   :  { %v2107_v17 = vrot.slane %v2105_v16, 2 }
0x222a   :  { %2108 = vrot.lane.b32.xlu0 %v2107_v17, %s3023_s7 }
0x229c   :  { %v2109_v19 = vpop.permute.xlu0 %2108 }
0x229d   :  { %2558 = vmatmul.mubr.msk.f32.vlgmr.msra.gmra.mrb[20].mxu0 %vm378_vm8, %v2109_v19 }
0x2370   :  { %v2178_v20 = vpop.f32.mrb[20].mxu0 }
0x2371   :  { %v2179_v3 = vadd.f32 %v3570_v28, %v2178_v20  ;;  %v2559_v21 = vpop.f32.mrb[21].mxu0  ;;  %v2209_v28 = vld [vmem:[%s3719_s10] sm:$0xff]  ;;  %s3024_s10 = smov [#allocation12]  }
0x2372   :  { %v2768_v39 = vpack.c.bf16 %v2210_v35, %v2209_v28 }
0x2373   :  { %2190 = vrot.lane.b32.xlu1 %v2179_v3, %s3020_s1  ;;  %v2182_v22 = vadd.f32 %v2179_v3, %v3589_v56 }
0x2374   :  { %2769 = vmatpush3.bf16.msra.mxu1 %v2768_v39 }
0x2375   :  { %v2395_v47 = vmul.f32 -1.442695, %v2182_v22  ;;  %2770 = vmatprep.subr.bf16.mxu1 %v3021_v23 }
0x2377   :  { %2876 = vpow2.f32 %v2395_v47 }
0x2381   :  { %v2877_v24 = vpop.eup %2876 }
0x2382   :  { %v2186_v25 = vadd.f32 1.0, %v2877_v24 }
0x2384   :  { %2878 = vrcp.f32 %v2186_v25 }
0x238e   :  { %v2879_v26 = vpop.eup %2878 }
0x238f   :  { %v2200_v12 = vsub.f32 1.0, %v2879_v26  ;;  %v2207_v40 = vmul.f32 %v2879_v26, %v2107_v17 }
0x23e5   :  { %v2191_v32 = vpop.permute.xlu1 %2190 }
0x23e6   :  { %v2193_v45 = vmul.f32 %v2879_v26, %v2191_v32 }
0x23e8   :  { %2195 = vrot.lane.b32.xlu0 %v2193_v45, %s3020_s1  ;;  %s2303_s1 = sshll.u32 %s3024_s10, 4  ;;  %s2304_s1 = int_to_ptr.vmem [resolvable:$true] %s2303_s1 }
0x23e9   :  { %s2980_s18 = scalar_lea.vmem %s2304_s1, 32  ;;  %p2985_p8 = scmp.lt.s32.totalorder %s2304_s1, %s2304_s1 }
0x23ea   :  { %p2981_p7 = scmp.ne.s32.totalorder %s2304_s1, %s2980_s18  ;;  %p2986_p9 = scmp.lt.s32.totalorder %s2980_s18, %s2980_s18 }
0x23ec   :  { %p2987_p10 = por %p2986_p9, %p2985_p8 }
0x23ee   :  { %p2988_p11 = pnand %p2987_p10, %p2981_p7 }
0x245a   :  { %v2196_v33 = vpop.permute.xlu0 %2195 }
0x245b   :  { %v2198_v34 = vadd.f32 %v2196_v33, %v3589_v56  ;;  %v2771_v56 = vpack.c.bf16 %v2212_v38, %v2211_v61 }
0x245d   :  { %2880 = vtanh.f32 %v2198_v34  ;;  %2772 = vmatpush3.bf16.msra.mxu1 %v2771_v56 }
0x2467   :  { %v2881_v46 = vpop.eup %2880 }
0x2468   :  { %2202 = vrot.lane.b32.xlu1 %v2881_v46, %s3023_s7 }
0x24da   :  { %v2203_v37 = vpop.permute.xlu1 %2202 }
0x24db   :  { %v2205_v41 = vmul.f32 %v2203_v37, %v2200_v12 }
0x24dd   :  { %v2208_v29 = vadd.f32 %v2207_v40, %v2205_v41 }
0x24df   :  { %2221 = vrot.lane.b32.xlu0 %v2208_v29, %s3023_s7 }
0x2551   :  { %v2222_v58 = vpop.permute.xlu0 %2221 }
0x2552   :  { %2569 = vmatmul.mubr.msk.f32.vlgmr.msra.gmra.mrb[16].mxu1 %vm378_vm8, %v2222_v58 }
0x2625   :  { %v2291_v49 = vpop.f32.mrb[16].mxu1 }
0x2626   :  { %v2292_v23 = vadd.f32 %v2396_v0, %v2291_v49  ;;  %v2570_v44 = vpop.f32.mrb[17].mxu1 }
0x2628   :  { %2296 = vst.msk [vmem:[#allocation12] sm:$0x3] %vm2295_vm12, %v2292_v23 }
0x2629   :  { %2991 = shalt.err (!%p2988_p11)
}
0x262a   :  { %s2992_s21 = scalar_lea.hbm %s3721_s12, 32 }
0x262b   :  { %p2993_p12 = scmp.ne.s32.totalorder %s3721_s12, %s2992_s21  ;;  %p2996_p13 = scmp.lt.u32.totalorder %s2992_s21, %s3721_s12 }
0x262d   :  { %p2998_p0 = pnand %p2996_p13, %p2993_p12 }
0x262f   :  { %3001 = shalt.err (!%p2998_p0)
}
0x2630   :  { %2306 = dma.vmem_to_hbm [thread:$0]  %s2304_s1, 32, %s3721_s12, [#allocation4]  }
0x2631   :  { %3010 = dma.done.wait [#allocation4], 32  }
0x2632   :  { %3011 = vsyncadd [#allocation4], 4294967264 }
0x2633   :  { %2310 = vsyncpa [#allocation3], 1 }
0x2634   :  { %2311 = vsyncpa [#allocation8], 1 }
0x2635   :  { %2312 = vsyncpa [#allocation11], 1 }
0x2636   :  { %2313 = vsyncpa [#allocation4], 1 }
0x2637   :  { %2314 = vsyncpa [#allocation5], 1 }

</bundles_post_ra>
